<compile_context>
chip_gen: v5e
topology: v5e:2x2
jax: 0.10.0
libtpu: 0.0.40
codegen_flags: <defaults>
</compile_context>

<pallas_src>
import jax
import jax.numpy as jnp
from jax.experimental import pallas as pl
from jax.experimental.pallas import tpu as pltpu

# ---- model hyper-parameters (small, consistent with the module) -------------
HID_DIM = 32
N_HEADS = 4
HEAD_DIM = HID_DIM // N_HEADS
PF_DIM = 64
N_LAYERS = 2
OUTPUT_DIM = 16
SEQ = 8
BATCH = 2
EPS = 1e-5  # nn.LayerNorm default


# =============================== kernel helpers ==============================
def _layer_norm(x, gamma, beta):
    mu = jnp.mean(x, axis=-1, keepdims=True)
    var = jnp.mean((x - mu) ** 2, axis=-1, keepdims=True)
    return (x - mu) * jax.lax.rsqrt(var + EPS) * gamma + beta


# ============================= fused forward kernel ==========================
def fused_forward_kernel(trg_ref, enc_ref, amask_ref, hmask_ref, onehot_ref,
                         wqkv_ref, bqkv_ref, wmat_ref, bmisc_ref,
                         wp1_ref, bp1_ref, wp2_ref,
                         wout_ref, bout_ref,
                         out_ref):
    BS, D = trg_ref.shape                         # (B*S, D)
    n_layers = wqkv_ref.shape[0]

    x = trg_ref[...]                              # (BS, D) folded-batch activations
    enc_b = enc_ref[...]                          # (B, D)  gene embeddings (per batch)
    amask = amask_ref[...]                        # (H*BS, BS) additive mask (0 / -1e10)
    hmask = hmask_ref[...]                        # (H*BS, D) head-lane selection mask
    onehot = onehot_ref[...]                      # (BS, B) batch -> folded-row broadcast

    for l in range(n_layers):
        wqkv = wqkv_ref[l]                        # (D, 3D) self-attn Q|K|V fused (Q pre-scaled)
        bqkv = bqkv_ref[l]                        # (1, 3D)
        base = 5 * l
        wo_s = wmat_ref[base + 0]                 # self-attn output proj   (D, D)
        wv_e = wmat_ref[base + 1]                 # cross-attn V proj       (D, D)
        wo_e = wmat_ref[base + 2]                 # cross-attn output proj  (D, D)
        fcw_e = wmat_ref[base + 3]                # fc half for trg_enc     (D, D)
        fcw_d = wmat_ref[base + 4]                # fc half for trg_dec     (D, D)
        bm = bmisc_ref[l]                         # (8, D) packed biases / LN params
        bo_s, bv_e, bo_e, fcb = bm[0:1], bm[1:2], bm[2:3], bm[3:4]
        lng, lnb, pfb2 = bm[4:5], bm[5:6], bm[6:7]

        # ---- encoder (drug -> gene) cross attention: key length == 1 --------
        # softmax over a single key is exactly 1, so the attention output is the
        # projected value; compute it on the (B, D) rows only, fold the fc-half
        # and the fc bias in, then broadcast once to (BS, D) via the one-hot.
        cr_b = jnp.dot(jnp.dot(enc_b, wv_e, preferred_element_type=jnp.float32) + bv_e,
                       wo_e, preferred_element_type=jnp.float32) + bo_e        # (B, D)
        cr_fc_b = jnp.dot(cr_b, fcw_e, preferred_element_type=jnp.float32) + fcb
        cr_fc = jnp.dot(onehot, cr_fc_b, preferred_element_type=jnp.float32)   # (BS, D)

        # ---- self attention over drug tokens (all heads in one stacked slab) -
        qkv = jnp.dot(x, wqkv, preferred_element_type=jnp.float32) + bqkv       # (BS, 3D)
        q = qkv[:, 0:D]                     # already scaled by 1/sqrt(HEAD_DIM)
        k = qkv[:, D:2 * D]
        v = qkv[:, 2 * D:3 * D]

        # Stack q once along sublanes (block h = head h) and zero lanes outside
        # head h; a single contraction against k then yields every head's energy.
        q_stack = jnp.concatenate([q] * N_HEADS, axis=0) * hmask                # (H*BS, D)
        e = jax.lax.dot_general(q_stack, k, (((1,), (1,)), ((), ())),
                                preferred_element_type=jnp.float32) + amask     # (H*BS, BS)
        e = e - jnp.max(e, axis=-1, keepdims=True)
        p = jnp.exp(e)
        a = p * pl.reciprocal(jnp.sum(p, axis=-1, keepdims=True), approx=True)
        o_stack = jnp.dot(a, v, preferred_element_type=jnp.float32) * hmask     # (H*BS, D)
        o = o_stack[0:BS]
        for h in range(1, N_HEADS):
            o = o + o_stack[h * BS:(h + 1) * BS]                                # (BS, D)
        sa = jnp.dot(o, wo_s, preferred_element_type=jnp.float32) + bo_s        # (BS, D)

        # fc(cat(trg_enc, trg_dec)) = trg_enc@fcw[:D] + trg_dec@fcw[D:] + fcb
        pre = jnp.dot(sa, fcw_d, preferred_element_type=jnp.float32) + cr_fc
        t1 = _layer_norm(x + jax.nn.relu(pre), lng, lnb)

        # positionwise feedforward (kernel_size=1 conv == per-position linear)
        hmid = jax.nn.relu(
            jnp.dot(t1, wp1_ref[l], preferred_element_type=jnp.float32) + bp1_ref[l])
        ff = jnp.dot(hmid, wp2_ref[l], preferred_element_type=jnp.float32) + pfb2
        x = _layer_norm(t1 + ff, lng, lnb)

    out_ref[...] = (jnp.dot(x, wout_ref[...], preferred_element_type=jnp.float32)
                    + bout_ref[...])


# ============================ parameter packing ==============================
def _pack_params(params):
    """Pack per-layer parameter tensors into a few stacked arrays.

    The 1/sqrt(HEAD_DIM) attention scale is folded into the self-attention Q
    projection (weight and bias) so the kernel never multiplies by it.
    """
    inv_scale = 1.0 / (float(HEAD_DIM) ** 0.5)
    wqkv, bqkv, wmat, bmisc, wp1, bp1, wp2 = [], [], [], [], [], [], []
    for (w8, b8, fcw, fcb, lng, lnb, pfw1, pfb1, pfw2, pfb2) in params["layers"]:
        D = w8.shape[1]
        # layout of w8/b8 (matches reference): 0..3 cross q,k,v,o ; 4..7 self q,k,v,o
        wqkv.append(jnp.concatenate([w8[4] * inv_scale, w8[5], w8[6]], axis=1))   # (D, 3D)
        bqkv.append(jnp.concatenate([b8[4] * inv_scale, b8[5], b8[6]])[None, :])  # (1, 3D)
        wmat.append(jnp.stack([w8[7], w8[2], w8[3], fcw[:D], fcw[D:]]))           # (5, D, D)
        bmisc.append(jnp.stack([b8[7], b8[2], b8[3], fcb, lng, lnb, pfb2,
                                jnp.zeros_like(fcb)]))                            # (8, D)
        wp1.append(pfw1)
        bp1.append(pfb1[None, :])
        wp2.append(pfw2)
    return (jnp.stack(wqkv), jnp.stack(bqkv),
            jnp.concatenate(wmat, axis=0),          # (L*5, D, D)
            jnp.stack(bmisc),                       # (L, 8, D)
            jnp.stack(wp1), jnp.stack(bp1), jnp.stack(wp2),
            params["fc_out_w"], params["fc_out_b"][None, :])


# ================================ full forward ===============================
def drug_gene_attention(trg, enc_src, trg_mask, src_mask, params):
    B, S, D = trg.shape
    BS = B * S
    L = len(params["layers"])
    O = params["fc_out_w"].shape[1]
    del src_mask  # numerically dead: softmax over a single encoder key == 1

    if trg_mask is None:
        trg_mask = jnp.ones((B, S, S), jnp.int32)
    tmask = trg_mask.astype(jnp.int32)

    # Folded additive mask: rows/cols indexed by folded (b, s); cross-batch
    # entries get -1e10 so one softmax over B*S keys equals per-batch softmax
    # (masked exps underflow to exactly 0 in f32). Pre-tiled over heads.
    bi = jnp.arange(BS) // S
    si = jnp.arange(BS) % S
    same = bi[:, None] == bi[None, :]
    keep = same & (tmask[bi[:, None], si[:, None], si[None, :]] != 0)
    add_mask = jnp.where(keep, 0.0, -1e10).astype(jnp.float32)          # (BS, BS)
    add_mask_t = jnp.tile(add_mask, (N_HEADS, 1))                       # (H*BS, BS)

    # Head-lane selection mask: row block h keeps lanes [h*HD, (h+1)*HD).
    hm = (jnp.arange(D)[None, :] // HEAD_DIM) == jnp.arange(N_HEADS)[:, None]
    hmask = jnp.repeat(hm.astype(jnp.float32), BS, axis=0)              # (H*BS, D)

    # Batch -> folded-row broadcast matrix for the cross-attention path.
    onehot = (bi[:, None] == jnp.arange(B)[None, :]).astype(jnp.float32)  # (BS, B)

    packed = _pack_params(params)

    grid_spec = pltpu.PrefetchScalarGridSpec(
        num_scalar_prefetch=0,
        grid=(1,),
        in_specs=[
            pl.BlockSpec((BS, D), lambda i: (0, 0)),                 # trg (folded)
            pl.BlockSpec((B, D), lambda i: (0, 0)),                  # enc_src
            pl.BlockSpec((N_HEADS * BS, BS), lambda i: (0, 0)),      # additive mask (tiled)
            pl.BlockSpec((N_HEADS * BS, D), lambda i: (0, 0)),       # head-lane mask
            pl.BlockSpec((BS, B), lambda i: (0, 0)),                 # batch one-hot
            pl.BlockSpec((L, D, 3 * D), lambda i: (0, 0, 0)),        # fused QKV W
            pl.BlockSpec((L, 1, 3 * D), lambda i: (0, 0, 0)),        # fused QKV b
            pl.BlockSpec((L * 5, D, D), lambda i: (0, 0, 0)),        # packed (D,D) mats
            pl.BlockSpec((L, 8, D), lambda i: (0, 0, 0)),            # packed biases/LN
            pl.BlockSpec((L, D, PF_DIM), lambda i: (0, 0, 0)),       # ffn W1
            pl.BlockSpec((L, 1, PF_DIM), lambda i: (0, 0, 0)),       # ffn b1
            pl.BlockSpec((L, PF_DIM, D), lambda i: (0, 0, 0)),       # ffn W2
            pl.BlockSpec((D, O), lambda i: (0, 0)),                  # fc_out W
            pl.BlockSpec((1, O), lambda i: (0, 0)),                  # fc_out b
        ],
        out_specs=pl.BlockSpec((BS, O), lambda i: (0, 0)),
    )
    out = pl.pallas_call(
        fused_forward_kernel,
        out_shape=jax.ShapeDtypeStruct((BS, O), jnp.float32),
        grid_spec=grid_spec,
        compiler_params=pltpu.CompilerParams(dimension_semantics=("arbitrary",)),
    )(trg.reshape(BS, D).astype(jnp.float32),
      enc_src.astype(jnp.float32),
      add_mask_t, hmask, onehot,
      *packed)
    return out.reshape(B, S, O), None   # last layer returns attention = None


# ============================== parameter init ===============================
def init_params(key):
    layers = []
    for _ in range(N_LAYERS):
        key, *ks = jax.random.split(key, 9)
        w8 = 0.05 * jax.random.normal(ks[0], (8, HID_DIM, HID_DIM), jnp.float32)
        b8 = 0.05 * jax.random.normal(ks[1], (8, HID_DIM), jnp.float32)
        fcw = 0.05 * jax.random.normal(ks[2], (2 * HID_DIM, HID_DIM), jnp.float32)
        fcb = 0.05 * jax.random.normal(ks[3], (HID_DIM,), jnp.float32)
        lng = jnp.ones((HID_DIM,), jnp.float32)     # nn.LayerNorm weight init
        lnb = jnp.zeros((HID_DIM,), jnp.float32)    # nn.LayerNorm bias init
        pfw1 = 0.05 * jax.random.normal(ks[4], (HID_DIM, PF_DIM), jnp.float32)
        pfb1 = 0.05 * jax.random.normal(ks[5], (PF_DIM,), jnp.float32)
        pfw2 = 0.05 * jax.random.normal(ks[6], (PF_DIM, HID_DIM), jnp.float32)
        pfb2 = 0.05 * jax.random.normal(ks[7], (HID_DIM,), jnp.float32)
        layers.append((w8, b8, fcw, fcb, lng, lnb, pfw1, pfb1, pfw2, pfb2))
    key, k1, k2 = jax.random.split(key, 3)
    return {
        "layers": layers,
        "fc_out_w": 0.05 * jax.random.normal(k1, (HID_DIM, OUTPUT_DIM), jnp.float32),
        "fc_out_b": 0.05 * jax.random.normal(k2, (OUTPUT_DIM,), jnp.float32),
    }


# ============================ pure-JAX reference =============================
def _mha_ref(q, k, v, wq, bq, wk, bk, wv, bv, wo, bo, mask4):
    B, Sq, D = q.shape
    Sk = k.shape[1]
    Q = (q @ wq + bq).reshape(B, Sq, N_HEADS, HEAD_DIM).transpose(0, 2, 1, 3)
    K = (k @ wk + bk).reshape(B, Sk, N_HEADS, HEAD_DIM).transpose(0, 2, 1, 3)
    V = (v @ wv + bv).reshape(B, Sk, N_HEADS, HEAD_DIM).transpose(0, 2, 1, 3)
    e = jnp.einsum("bhqd,bhkd->bhqk", Q, K) / (float(HEAD_DIM) ** 0.5)
    e = jnp.where(mask4 == 0, -1e10, e)
    a = jax.nn.softmax(e, axis=-1)
    x = jnp.einsum("bhqk,bhkd->bhqd", a, V).transpose(0, 2, 1, 3).reshape(B, Sq, D)
    return x @ wo + bo


def _layer_ref(trg, enc, tmask4, smask4, lp):
    (w8, b8, fcw, fcb, lng, lnb, pfw1, pfb1, pfw2, pfb2) = lp

    def ln(y):
        mu = y.mean(-1, keepdims=True)
        var = ((y - mu) ** 2).mean(-1, keepdims=True)
        return (y - mu) / jnp.sqrt(var + EPS) * lng + lnb

    trg_enc = _mha_ref(trg, enc, enc, w8[0], b8[0], w8[1], b8[1],
                       w8[2], b8[2], w8[3], b8[3], smask4)
    trg_dec = _mha_ref(trg, trg, trg, w8[4], b8[4], w8[5], b8[5],
                       w8[6], b8[6], w8[7], b8[7], tmask4)
    cat = jnp.concatenate([trg_enc, trg_dec], axis=-1)
    x = jax.nn.relu(cat @ fcw + fcb)
    t1 = ln(trg + x)
    ff = jax.nn.relu(t1 @ pfw1 + pfb1) @ pfw2 + pfb2
    return ln(t1 + ff)


def reference(trg, enc_src, trg_mask, src_mask, params):
    B, S, D = trg.shape
    enc = enc_src.reshape(B, 1, D)
    tmask4 = trg_mask[:, None, :, :]          # (B,1,S,S)
    smask4 = src_mask.reshape(B, 1, 1, 1)     # (B,1,1,1)
    x = trg
    for lp in params["layers"]:
        x = _layer_ref(x, enc, tmask4, smask4, lp)
    return x @ params["fc_out_w"] + params["fc_out_b"]


# ==================================== main ===================================
if __name__ == "__main__":
    key = jax.random.PRNGKey(0)
    key, kt, ke = jax.random.split(key, 3)
    trg = jax.random.normal(kt, (BATCH, SEQ, HID_DIM), jnp.float32)
    enc_src = jax.random.normal(ke, (BATCH, HID_DIM), jnp.float32)
    # causal target mask, all-ones source mask
    trg_mask = jnp.broadcast_to(
        jnp.tril(jnp.ones((SEQ, SEQ), jnp.int32)), (BATCH, SEQ, SEQ))
    src_mask = jnp.ones((BATCH, 1), jnp.int32)

    params = init_params(key)

    out, attn = drug_gene_attention(trg, enc_src, trg_mask, src_mask, params)
    out = jax.block_until_ready(out)

    ref = reference(trg, enc_src, trg_mask, src_mask, params)
    assert out.shape == (BATCH, SEQ, OUTPUT_DIM)
    # approx=True softmax reciprocal -> slightly looser (but still tight) tolerance
    assert jnp.allclose(out, ref, atol=3e-3, rtol=3e-3), "mismatch vs reference"
    print("KERNEL_OK")
</pallas_src>

<mosaic_0001>
module attributes {stable_mosaic.version = 11 : i64} {
  func.func @fused_forward_kernel(%arg0: i32, %arg1: memref<16x32xf32, #tpu.memory_space<vmem>>, %arg2: memref<2x32xf32, #tpu.memory_space<vmem>>, %arg3: memref<64x16xf32, #tpu.memory_space<vmem>>, %arg4: memref<64x32xf32, #tpu.memory_space<vmem>>, %arg5: memref<16x2xf32, #tpu.memory_space<vmem>>, %arg6: memref<2x32x96xf32, #tpu.memory_space<vmem>>, %arg7: memref<2x1x96xf32, #tpu.memory_space<vmem>>, %arg8: memref<10x32x32xf32, #tpu.memory_space<vmem>>, %arg9: memref<2x8x32xf32, #tpu.memory_space<vmem>>, %arg10: memref<2x32x64xf32, #tpu.memory_space<vmem>>, %arg11: memref<2x1x64xf32, #tpu.memory_space<vmem>>, %arg12: memref<2x64x32xf32, #tpu.memory_space<vmem>>, %arg13: memref<32x16xf32, #tpu.memory_space<vmem>>, %arg14: memref<1x16xf32, #tpu.memory_space<vmem>>, %arg15: memref<16x16xf32, #tpu.memory_space<vmem>>) attributes {dimension_semantics = [#tpu.dimension_semantics<arbitrary>], iteration_bounds = array<i64: 1>, scalar_prefetch = 0 : i64, scratch_operands = 0 : i64, tpu.core_type = #tpu.core_type<tc>, window_params = [{pipeline_mode = #tpu.pipeline_mode<synchronous>, transform_indices = @transform_0, window_bounds = array<i64: 16, 32>}, {pipeline_mode = #tpu.pipeline_mode<synchronous>, transform_indices = @transform_1, window_bounds = array<i64: 2, 32>}, {pipeline_mode = #tpu.pipeline_mode<synchronous>, transform_indices = @transform_2, window_bounds = array<i64: 64, 16>}, {pipeline_mode = #tpu.pipeline_mode<synchronous>, transform_indices = @transform_3, window_bounds = array<i64: 64, 32>}, {pipeline_mode = #tpu.pipeline_mode<synchronous>, transform_indices = @transform_4, window_bounds = array<i64: 16, 2>}, {pipeline_mode = #tpu.pipeline_mode<synchronous>, transform_indices = @transform_5, window_bounds = array<i64: 2, 32, 96>}, {pipeline_mode = #tpu.pipeline_mode<synchronous>, transform_indices = @transform_6, window_bounds = array<i64: 2, 1, 96>}, {pipeline_mode = #tpu.pipeline_mode<synchronous>, transform_indices = @transform_7, window_bounds = array<i64: 10, 32, 32>}, {pipeline_mode = #tpu.pipeline_mode<synchronous>, transform_indices = @transform_8, window_bounds = array<i64: 2, 8, 32>}, {pipeline_mode = #tpu.pipeline_mode<synchronous>, transform_indices = @transform_9, window_bounds = array<i64: 2, 32, 64>}, {pipeline_mode = #tpu.pipeline_mode<synchronous>, transform_indices = @transform_10, window_bounds = array<i64: 2, 1, 64>}, {pipeline_mode = #tpu.pipeline_mode<synchronous>, transform_indices = @transform_11, window_bounds = array<i64: 2, 64, 32>}, {pipeline_mode = #tpu.pipeline_mode<synchronous>, transform_indices = @transform_12, window_bounds = array<i64: 32, 16>}, {pipeline_mode = #tpu.pipeline_mode<synchronous>, transform_indices = @transform_13, window_bounds = array<i64: 1, 16>}, {pipeline_mode = #tpu.pipeline_mode<synchronous>, transform_indices = @transform_14, window_bounds = array<i64: 16, 16>}]} {
    %c0 = arith.constant 0 : index
    %c0_0 = arith.constant 0 : index
    %0 = vector.load %arg1[%c0, %c0_0] : memref<16x32xf32, #tpu.memory_space<vmem>>, vector<16x32xf32>
    %c0_1 = arith.constant 0 : index
    %c0_2 = arith.constant 0 : index
    %1 = vector.load %arg2[%c0_1, %c0_2] : memref<2x32xf32, #tpu.memory_space<vmem>>, vector<2x32xf32>
    %c0_3 = arith.constant 0 : index
    %c0_4 = arith.constant 0 : index
    %2 = vector.load %arg3[%c0_3, %c0_4] : memref<64x16xf32, #tpu.memory_space<vmem>>, vector<64x16xf32>
    %c0_5 = arith.constant 0 : index
    %c0_6 = arith.constant 0 : index
    %3 = vector.load %arg4[%c0_5, %c0_6] : memref<64x32xf32, #tpu.memory_space<vmem>>, vector<64x32xf32>
    %c0_7 = arith.constant 0 : index
    %c0_8 = arith.constant 0 : index
    %4 = vector.load %arg5[%c0_7, %c0_8] : memref<16x2xf32, #tpu.memory_space<vmem>>, vector<16x2xf32>
    %c0_9 = arith.constant 0 : index
    %c0_10 = arith.constant 0 : index
    %c0_11 = arith.constant 0 : index
    %5 = vector.load %arg6[%c0_9, %c0_10, %c0_11] : memref<2x32x96xf32, #tpu.memory_space<vmem>>, vector<1x32x96xf32>
    %6 = vector.shape_cast %5 : vector<1x32x96xf32> to vector<32x96xf32>
    %c0_12 = arith.constant 0 : index
    %c0_13 = arith.constant 0 : index
    %c0_14 = arith.constant 0 : index
    %7 = vector.load %arg7[%c0_12, %c0_13, %c0_14] : memref<2x1x96xf32, #tpu.memory_space<vmem>>, vector<1x1x96xf32>
    %8 = vector.shape_cast %7 : vector<1x1x96xf32> to vector<1x96xf32>
    %c0_15 = arith.constant 0 : index
    %c0_16 = arith.constant 0 : index
    %c0_17 = arith.constant 0 : index
    %9 = vector.load %arg8[%c0_15, %c0_16, %c0_17] : memref<10x32x32xf32, #tpu.memory_space<vmem>>, vector<1x32x32xf32>
    %10 = vector.shape_cast %9 : vector<1x32x32xf32> to vector<32x32xf32>
    %c1 = arith.constant 1 : index
    %c0_18 = arith.constant 0 : index
    %c0_19 = arith.constant 0 : index
    %11 = vector.load %arg8[%c1, %c0_18, %c0_19] : memref<10x32x32xf32, #tpu.memory_space<vmem>>, vector<1x32x32xf32>
    %12 = vector.shape_cast %11 : vector<1x32x32xf32> to vector<32x32xf32>
    %c2 = arith.constant 2 : index
    %c0_20 = arith.constant 0 : index
    %c0_21 = arith.constant 0 : index
    %13 = vector.load %arg8[%c2, %c0_20, %c0_21] : memref<10x32x32xf32, #tpu.memory_space<vmem>>, vector<1x32x32xf32>
    %14 = vector.shape_cast %13 : vector<1x32x32xf32> to vector<32x32xf32>
    %c3 = arith.constant 3 : index
    %c0_22 = arith.constant 0 : index
    %c0_23 = arith.constant 0 : index
    %15 = vector.load %arg8[%c3, %c0_22, %c0_23] : memref<10x32x32xf32, #tpu.memory_space<vmem>>, vector<1x32x32xf32>
    %16 = vector.shape_cast %15 : vector<1x32x32xf32> to vector<32x32xf32>
    %c4 = arith.constant 4 : index
    %c0_24 = arith.constant 0 : index
    %c0_25 = arith.constant 0 : index
    %17 = vector.load %arg8[%c4, %c0_24, %c0_25] : memref<10x32x32xf32, #tpu.memory_space<vmem>>, vector<1x32x32xf32>
    %18 = vector.shape_cast %17 : vector<1x32x32xf32> to vector<32x32xf32>
    %c0_26 = arith.constant 0 : index
    %c0_27 = arith.constant 0 : index
    %c0_28 = arith.constant 0 : index
    %19 = vector.load %arg9[%c0_26, %c0_27, %c0_28] : memref<2x8x32xf32, #tpu.memory_space<vmem>>, vector<1x8x32xf32>
    %20 = vector.shape_cast %19 : vector<1x8x32xf32> to vector<8x32xf32>
    %21 = vector.extract_strided_slice %20 {offsets = [0, 0], sizes = [1, 32], strides = [1, 1]} : vector<8x32xf32> to vector<1x32xf32>
    %22 = vector.extract_strided_slice %20 {offsets = [1, 0], sizes = [1, 32], strides = [1, 1]} : vector<8x32xf32> to vector<1x32xf32>
    %23 = vector.extract_strided_slice %20 {offsets = [2, 0], sizes = [1, 32], strides = [1, 1]} : vector<8x32xf32> to vector<1x32xf32>
    %24 = vector.extract_strided_slice %20 {offsets = [3, 0], sizes = [1, 32], strides = [1, 1]} : vector<8x32xf32> to vector<1x32xf32>
    %25 = vector.extract_strided_slice %20 {offsets = [4, 0], sizes = [1, 32], strides = [1, 1]} : vector<8x32xf32> to vector<1x32xf32>
    %26 = vector.extract_strided_slice %20 {offsets = [5, 0], sizes = [1, 32], strides = [1, 1]} : vector<8x32xf32> to vector<1x32xf32>
    %27 = vector.extract_strided_slice %20 {offsets = [6, 0], sizes = [1, 32], strides = [1, 1]} : vector<8x32xf32> to vector<1x32xf32>
    %cst = arith.constant dense<0.000000e+00> : vector<2x32xf32>
    %28 = tpu.matmul %1, %12, %cst {dimension_numbers = #tpu.dot_dimension_numbers<[1], [0], [0], [1], [0, 0, 1, 1], [], []>} : vector<2x32xf32>, vector<32x32xf32>, vector<2x32xf32> -> vector<2x32xf32>
    %29 = vector.broadcast %22 : vector<1x32xf32> to vector<2x32xf32>
    %30 = arith.addf %28, %29 : vector<2x32xf32>
    %cst_29 = arith.constant dense<0.000000e+00> : vector<2x32xf32>
    %31 = tpu.matmul %30, %14, %cst_29 {dimension_numbers = #tpu.dot_dimension_numbers<[1], [0], [0], [1], [0, 0, 1, 1], [], []>} : vector<2x32xf32>, vector<32x32xf32>, vector<2x32xf32> -> vector<2x32xf32>
    %32 = vector.broadcast %23 : vector<1x32xf32> to vector<2x32xf32>
    %33 = arith.addf %31, %32 : vector<2x32xf32>
    %cst_30 = arith.constant dense<0.000000e+00> : vector<2x32xf32>
    %34 = tpu.matmul %33, %16, %cst_30 {dimension_numbers = #tpu.dot_dimension_numbers<[1], [0], [0], [1], [0, 0, 1, 1], [], []>} : vector<2x32xf32>, vector<32x32xf32>, vector<2x32xf32> -> vector<2x32xf32>
    %35 = vector.broadcast %24 : vector<1x32xf32> to vector<2x32xf32>
    %36 = arith.addf %34, %35 : vector<2x32xf32>
    %cst_31 = arith.constant dense<0.000000e+00> : vector<16x32xf32>
    %37 = tpu.matmul %4, %36, %cst_31 {dimension_numbers = #tpu.dot_dimension_numbers<[1], [0], [0], [1], [0, 0, 1, 1], [], []>} : vector<16x2xf32>, vector<2x32xf32>, vector<16x32xf32> -> vector<16x32xf32>
    %cst_32 = arith.constant dense<0.000000e+00> : vector<16x96xf32>
    %38 = tpu.matmul %0, %6, %cst_32 {dimension_numbers = #tpu.dot_dimension_numbers<[1], [0], [0], [1], [0, 0, 1, 1], [], []>} : vector<16x32xf32>, vector<32x96xf32>, vector<16x96xf32> -> vector<16x96xf32>
    %39 = vector.broadcast %8 : vector<1x96xf32> to vector<16x96xf32>
    %40 = arith.addf %38, %39 : vector<16x96xf32>
    %41 = vector.extract_strided_slice %40 {offsets = [0, 0], sizes = [16, 32], strides = [1, 1]} : vector<16x96xf32> to vector<16x32xf32>
    %42 = vector.extract_strided_slice %40 {offsets = [0, 32], sizes = [16, 32], strides = [1, 1]} : vector<16x96xf32> to vector<16x32xf32>
    %43 = vector.extract_strided_slice %40 {offsets = [0, 64], sizes = [16, 32], strides = [1, 1]} : vector<16x96xf32> to vector<16x32xf32>
    %44 = tpu.concatenate %41, %41, %41, %41 in 0 : vector<16x32xf32>, vector<16x32xf32>, vector<16x32xf32>, vector<16x32xf32> -> vector<64x32xf32>
    %45 = arith.mulf %44, %3 : vector<64x32xf32>
    %cst_33 = arith.constant dense<0.000000e+00> : vector<64x16xf32>
    %46 = tpu.matmul %45, %42, %cst_33 {dimension_numbers = #tpu.dot_dimension_numbers<[1], [1], [0], [0], [0, 0, 1, 0], [], []>} : vector<64x32xf32>, vector<16x32xf32>, vector<64x16xf32> -> vector<64x16xf32>
    %47 = arith.addf %46, %2 : vector<64x16xf32>
    %cst_34 = arith.constant dense<0xFF800000> : vector<64xf32>
    %48 = vector.multi_reduction <maximumf>, %47, %cst_34 [1] : vector<64x16xf32> to vector<64xf32>
    %49 = vector.shape_cast %48 : vector<64xf32> to vector<64x1xf32>
    %50 = vector.broadcast %49 : vector<64x1xf32> to vector<64x16xf32>
    %51 = arith.subf %47, %50 : vector<64x16xf32>
    %52 = math.exp %51 : vector<64x16xf32>
    %cst_35 = arith.constant dense<0.000000e+00> : vector<64xf32>
    %53 = vector.multi_reduction <add>, %52, %cst_35 [1] : vector<64x16xf32> to vector<64xf32>
    %54 = vector.shape_cast %53 : vector<64xf32> to vector<64x1xf32>
    %55 = tpu.reciprocal %54 {approx = true} : vector<64x1xf32> -> vector<64x1xf32>
    %56 = vector.broadcast %55 : vector<64x1xf32> to vector<64x16xf32>
    %57 = arith.mulf %52, %56 : vector<64x16xf32>
    %cst_36 = arith.constant dense<0.000000e+00> : vector<64x32xf32>
    %58 = tpu.matmul %57, %43, %cst_36 {dimension_numbers = #tpu.dot_dimension_numbers<[1], [0], [0], [1], [0, 0, 1, 1], [], []>} : vector<64x16xf32>, vector<16x32xf32>, vector<64x32xf32> -> vector<64x32xf32>
    %59 = arith.mulf %58, %3 : vector<64x32xf32>
    %60 = vector.extract_strided_slice %59 {offsets = [0, 0], sizes = [16, 32], strides = [1, 1]} : vector<64x32xf32> to vector<16x32xf32>
    %61 = vector.extract_strided_slice %59 {offsets = [16, 0], sizes = [16, 32], strides = [1, 1]} : vector<64x32xf32> to vector<16x32xf32>
    %62 = arith.addf %60, %61 : vector<16x32xf32>
    %63 = vector.extract_strided_slice %59 {offsets = [32, 0], sizes = [16, 32], strides = [1, 1]} : vector<64x32xf32> to vector<16x32xf32>
    %64 = arith.addf %62, %63 : vector<16x32xf32>
    %65 = vector.extract_strided_slice %59 {offsets = [48, 0], sizes = [16, 32], strides = [1, 1]} : vector<64x32xf32> to vector<16x32xf32>
    %66 = arith.addf %64, %65 : vector<16x32xf32>
    %cst_37 = arith.constant dense<0.000000e+00> : vector<16x32xf32>
    %67 = tpu.matmul %66, %10, %cst_37 {dimension_numbers = #tpu.dot_dimension_numbers<[1], [0], [0], [1], [0, 0, 1, 1], [], []>} : vector<16x32xf32>, vector<32x32xf32>, vector<16x32xf32> -> vector<16x32xf32>
    %68 = vector.broadcast %21 : vector<1x32xf32> to vector<16x32xf32>
    %69 = arith.addf %67, %68 : vector<16x32xf32>
    %cst_38 = arith.constant dense<0.000000e+00> : vector<16x32xf32>
    %70 = tpu.matmul %69, %18, %cst_38 {dimension_numbers = #tpu.dot_dimension_numbers<[1], [0], [0], [1], [0, 0, 1, 1], [], []>} : vector<16x32xf32>, vector<32x32xf32>, vector<16x32xf32> -> vector<16x32xf32>
    %71 = arith.addf %70, %37 : vector<16x32xf32>
    %cst_39 = arith.constant 0.000000e+00 : f32
    %72 = vector.broadcast %cst_39 : f32 to vector<16x32xf32>
    %73 = arith.maximumf %71, %72 : vector<16x32xf32>
    %74 = arith.addf %0, %73 : vector<16x32xf32>
    %cst_40 = arith.constant dense<0.000000e+00> : vector<16xf32>
    %75 = vector.multi_reduction <add>, %74, %cst_40 [1] : vector<16x32xf32> to vector<16xf32>
    %76 = vector.shape_cast %75 : vector<16xf32> to vector<16x1xf32>
    %cst_41 = arith.constant 3.200000e+01 : f32
    %77 = vector.broadcast %cst_41 : f32 to vector<16x1xf32>
    %78 = arith.divf %76, %77 : vector<16x1xf32>
    %79 = vector.broadcast %78 : vector<16x1xf32> to vector<16x32xf32>
    %80 = arith.subf %74, %79 : vector<16x32xf32>
    %81 = arith.mulf %80, %80 : vector<16x32xf32>
    %cst_42 = arith.constant dense<0.000000e+00> : vector<16xf32>
    %82 = vector.multi_reduction <add>, %81, %cst_42 [1] : vector<16x32xf32> to vector<16xf32>
    %83 = vector.shape_cast %82 : vector<16xf32> to vector<16x1xf32>
    %cst_43 = arith.constant 3.200000e+01 : f32
    %84 = vector.broadcast %cst_43 : f32 to vector<16x1xf32>
    %85 = arith.divf %83, %84 : vector<16x1xf32>
    %86 = vector.broadcast %78 : vector<16x1xf32> to vector<16x32xf32>
    %87 = arith.subf %74, %86 : vector<16x32xf32>
    %cst_44 = arith.constant 9.99999974E-6 : f32
    %88 = vector.broadcast %cst_44 : f32 to vector<16x1xf32>
    %89 = arith.addf %85, %88 : vector<16x1xf32>
    %90 = math.rsqrt %89 : vector<16x1xf32>
    %91 = vector.broadcast %90 : vector<16x1xf32> to vector<16x32xf32>
    %92 = arith.mulf %87, %91 : vector<16x32xf32>
    %93 = vector.broadcast %25 : vector<1x32xf32> to vector<16x32xf32>
    %94 = arith.mulf %92, %93 : vector<16x32xf32>
    %95 = vector.broadcast %26 : vector<1x32xf32> to vector<16x32xf32>
    %96 = arith.addf %94, %95 : vector<16x32xf32>
    %c0_45 = arith.constant 0 : index
    %c0_46 = arith.constant 0 : index
    %c0_47 = arith.constant 0 : index
    %97 = vector.load %arg10[%c0_45, %c0_46, %c0_47] : memref<2x32x64xf32, #tpu.memory_space<vmem>>, vector<1x32x64xf32>
    %98 = vector.shape_cast %97 : vector<1x32x64xf32> to vector<32x64xf32>
    %cst_48 = arith.constant dense<0.000000e+00> : vector<16x64xf32>
    %99 = tpu.matmul %96, %98, %cst_48 {dimension_numbers = #tpu.dot_dimension_numbers<[1], [0], [0], [1], [0, 0, 1, 1], [], []>} : vector<16x32xf32>, vector<32x64xf32>, vector<16x64xf32> -> vector<16x64xf32>
    %c0_49 = arith.constant 0 : index
    %c0_50 = arith.constant 0 : index
    %c0_51 = arith.constant 0 : index
    %100 = vector.load %arg11[%c0_49, %c0_50, %c0_51] : memref<2x1x64xf32, #tpu.memory_space<vmem>>, vector<1x1x64xf32>
    %101 = vector.shape_cast %100 : vector<1x1x64xf32> to vector<1x64xf32>
    %102 = vector.broadcast %101 : vector<1x64xf32> to vector<16x64xf32>
    %103 = arith.addf %99, %102 : vector<16x64xf32>
    %cst_52 = arith.constant 0.000000e+00 : f32
    %104 = vector.broadcast %cst_52 : f32 to vector<16x64xf32>
    %105 = arith.maximumf %103, %104 : vector<16x64xf32>
    %c0_53 = arith.constant 0 : index
    %c0_54 = arith.constant 0 : index
    %c0_55 = arith.constant 0 : index
    %106 = vector.load %arg12[%c0_53, %c0_54, %c0_55] : memref<2x64x32xf32, #tpu.memory_space<vmem>>, vector<1x64x32xf32>
    %107 = vector.shape_cast %106 : vector<1x64x32xf32> to vector<64x32xf32>
    %cst_56 = arith.constant dense<0.000000e+00> : vector<16x32xf32>
    %108 = tpu.matmul %105, %107, %cst_56 {dimension_numbers = #tpu.dot_dimension_numbers<[1], [0], [0], [1], [0, 0, 1, 1], [], []>} : vector<16x64xf32>, vector<64x32xf32>, vector<16x32xf32> -> vector<16x32xf32>
    %109 = vector.broadcast %27 : vector<1x32xf32> to vector<16x32xf32>
    %110 = arith.addf %108, %109 : vector<16x32xf32>
    %111 = arith.addf %96, %110 : vector<16x32xf32>
    %cst_57 = arith.constant dense<0.000000e+00> : vector<16xf32>
    %112 = vector.multi_reduction <add>, %111, %cst_57 [1] : vector<16x32xf32> to vector<16xf32>
    %113 = vector.shape_cast %112 : vector<16xf32> to vector<16x1xf32>
    %cst_58 = arith.constant 3.200000e+01 : f32
    %114 = vector.broadcast %cst_58 : f32 to vector<16x1xf32>
    %115 = arith.divf %113, %114 : vector<16x1xf32>
    %116 = vector.broadcast %115 : vector<16x1xf32> to vector<16x32xf32>
    %117 = arith.subf %111, %116 : vector<16x32xf32>
    %118 = arith.mulf %117, %117 : vector<16x32xf32>
    %cst_59 = arith.constant dense<0.000000e+00> : vector<16xf32>
    %119 = vector.multi_reduction <add>, %118, %cst_59 [1] : vector<16x32xf32> to vector<16xf32>
    %120 = vector.shape_cast %119 : vector<16xf32> to vector<16x1xf32>
    %cst_60 = arith.constant 3.200000e+01 : f32
    %121 = vector.broadcast %cst_60 : f32 to vector<16x1xf32>
    %122 = arith.divf %120, %121 : vector<16x1xf32>
    %123 = vector.broadcast %115 : vector<16x1xf32> to vector<16x32xf32>
    %124 = arith.subf %111, %123 : vector<16x32xf32>
    %cst_61 = arith.constant 9.99999974E-6 : f32
    %125 = vector.broadcast %cst_61 : f32 to vector<16x1xf32>
    %126 = arith.addf %122, %125 : vector<16x1xf32>
    %127 = math.rsqrt %126 : vector<16x1xf32>
    %128 = vector.broadcast %127 : vector<16x1xf32> to vector<16x32xf32>
    %129 = arith.mulf %124, %128 : vector<16x32xf32>
    %130 = vector.broadcast %25 : vector<1x32xf32> to vector<16x32xf32>
    %131 = arith.mulf %129, %130 : vector<16x32xf32>
    %132 = vector.broadcast %26 : vector<1x32xf32> to vector<16x32xf32>
    %133 = arith.addf %131, %132 : vector<16x32xf32>
    %c1_62 = arith.constant 1 : index
    %c0_63 = arith.constant 0 : index
    %c0_64 = arith.constant 0 : index
    %134 = vector.load %arg6[%c1_62, %c0_63, %c0_64] : memref<2x32x96xf32, #tpu.memory_space<vmem>>, vector<1x32x96xf32>
    %135 = vector.shape_cast %134 : vector<1x32x96xf32> to vector<32x96xf32>
    %c1_65 = arith.constant 1 : index
    %c0_66 = arith.constant 0 : index
    %c0_67 = arith.constant 0 : index
    %136 = vector.load %arg7[%c1_65, %c0_66, %c0_67] : memref<2x1x96xf32, #tpu.memory_space<vmem>>, vector<1x1x96xf32>
    %137 = vector.shape_cast %136 : vector<1x1x96xf32> to vector<1x96xf32>
    %c5 = arith.constant 5 : index
    %c0_68 = arith.constant 0 : index
    %c0_69 = arith.constant 0 : index
    %138 = vector.load %arg8[%c5, %c0_68, %c0_69] : memref<10x32x32xf32, #tpu.memory_space<vmem>>, vector<1x32x32xf32>
    %139 = vector.shape_cast %138 : vector<1x32x32xf32> to vector<32x32xf32>
    %c6 = arith.constant 6 : index
    %c0_70 = arith.constant 0 : index
    %c0_71 = arith.constant 0 : index
    %140 = vector.load %arg8[%c6, %c0_70, %c0_71] : memref<10x32x32xf32, #tpu.memory_space<vmem>>, vector<1x32x32xf32>
    %141 = vector.shape_cast %140 : vector<1x32x32xf32> to vector<32x32xf32>
    %c7 = arith.constant 7 : index
    %c0_72 = arith.constant 0 : index
    %c0_73 = arith.constant 0 : index
    %142 = vector.load %arg8[%c7, %c0_72, %c0_73] : memref<10x32x32xf32, #tpu.memory_space<vmem>>, vector<1x32x32xf32>
    %143 = vector.shape_cast %142 : vector<1x32x32xf32> to vector<32x32xf32>
    %c8 = arith.constant 8 : index
    %c0_74 = arith.constant 0 : index
    %c0_75 = arith.constant 0 : index
    %144 = vector.load %arg8[%c8, %c0_74, %c0_75] : memref<10x32x32xf32, #tpu.memory_space<vmem>>, vector<1x32x32xf32>
    %145 = vector.shape_cast %144 : vector<1x32x32xf32> to vector<32x32xf32>
    %c9 = arith.constant 9 : index
    %c0_76 = arith.constant 0 : index
    %c0_77 = arith.constant 0 : index
    %146 = vector.load %arg8[%c9, %c0_76, %c0_77] : memref<10x32x32xf32, #tpu.memory_space<vmem>>, vector<1x32x32xf32>
    %147 = vector.shape_cast %146 : vector<1x32x32xf32> to vector<32x32xf32>
    %c1_78 = arith.constant 1 : index
    %c0_79 = arith.constant 0 : index
    %c0_80 = arith.constant 0 : index
    %148 = vector.load %arg9[%c1_78, %c0_79, %c0_80] : memref<2x8x32xf32, #tpu.memory_space<vmem>>, vector<1x8x32xf32>
    %149 = vector.shape_cast %148 : vector<1x8x32xf32> to vector<8x32xf32>
    %150 = vector.extract_strided_slice %149 {offsets = [0, 0], sizes = [1, 32], strides = [1, 1]} : vector<8x32xf32> to vector<1x32xf32>
    %151 = vector.extract_strided_slice %149 {offsets = [1, 0], sizes = [1, 32], strides = [1, 1]} : vector<8x32xf32> to vector<1x32xf32>
    %152 = vector.extract_strided_slice %149 {offsets = [2, 0], sizes = [1, 32], strides = [1, 1]} : vector<8x32xf32> to vector<1x32xf32>
    %153 = vector.extract_strided_slice %149 {offsets = [3, 0], sizes = [1, 32], strides = [1, 1]} : vector<8x32xf32> to vector<1x32xf32>
    %154 = vector.extract_strided_slice %149 {offsets = [4, 0], sizes = [1, 32], strides = [1, 1]} : vector<8x32xf32> to vector<1x32xf32>
    %155 = vector.extract_strided_slice %149 {offsets = [5, 0], sizes = [1, 32], strides = [1, 1]} : vector<8x32xf32> to vector<1x32xf32>
    %156 = vector.extract_strided_slice %149 {offsets = [6, 0], sizes = [1, 32], strides = [1, 1]} : vector<8x32xf32> to vector<1x32xf32>
    %cst_81 = arith.constant dense<0.000000e+00> : vector<2x32xf32>
    %157 = tpu.matmul %1, %141, %cst_81 {dimension_numbers = #tpu.dot_dimension_numbers<[1], [0], [0], [1], [0, 0, 1, 1], [], []>} : vector<2x32xf32>, vector<32x32xf32>, vector<2x32xf32> -> vector<2x32xf32>
    %158 = vector.broadcast %151 : vector<1x32xf32> to vector<2x32xf32>
    %159 = arith.addf %157, %158 : vector<2x32xf32>
    %cst_82 = arith.constant dense<0.000000e+00> : vector<2x32xf32>
    %160 = tpu.matmul %159, %143, %cst_82 {dimension_numbers = #tpu.dot_dimension_numbers<[1], [0], [0], [1], [0, 0, 1, 1], [], []>} : vector<2x32xf32>, vector<32x32xf32>, vector<2x32xf32> -> vector<2x32xf32>
    %161 = vector.broadcast %152 : vector<1x32xf32> to vector<2x32xf32>
    %162 = arith.addf %160, %161 : vector<2x32xf32>
    %cst_83 = arith.constant dense<0.000000e+00> : vector<2x32xf32>
    %163 = tpu.matmul %162, %145, %cst_83 {dimension_numbers = #tpu.dot_dimension_numbers<[1], [0], [0], [1], [0, 0, 1, 1], [], []>} : vector<2x32xf32>, vector<32x32xf32>, vector<2x32xf32> -> vector<2x32xf32>
    %164 = vector.broadcast %153 : vector<1x32xf32> to vector<2x32xf32>
    %165 = arith.addf %163, %164 : vector<2x32xf32>
    %cst_84 = arith.constant dense<0.000000e+00> : vector<16x32xf32>
    %166 = tpu.matmul %4, %165, %cst_84 {dimension_numbers = #tpu.dot_dimension_numbers<[1], [0], [0], [1], [0, 0, 1, 1], [], []>} : vector<16x2xf32>, vector<2x32xf32>, vector<16x32xf32> -> vector<16x32xf32>
    %cst_85 = arith.constant dense<0.000000e+00> : vector<16x96xf32>
    %167 = tpu.matmul %133, %135, %cst_85 {dimension_numbers = #tpu.dot_dimension_numbers<[1], [0], [0], [1], [0, 0, 1, 1], [], []>} : vector<16x32xf32>, vector<32x96xf32>, vector<16x96xf32> -> vector<16x96xf32>
    %168 = vector.broadcast %137 : vector<1x96xf32> to vector<16x96xf32>
    %169 = arith.addf %167, %168 : vector<16x96xf32>
    %170 = vector.extract_strided_slice %169 {offsets = [0, 0], sizes = [16, 32], strides = [1, 1]} : vector<16x96xf32> to vector<16x32xf32>
    %171 = vector.extract_strided_slice %169 {offsets = [0, 32], sizes = [16, 32], strides = [1, 1]} : vector<16x96xf32> to vector<16x32xf32>
    %172 = vector.extract_strided_slice %169 {offsets = [0, 64], sizes = [16, 32], strides = [1, 1]} : vector<16x96xf32> to vector<16x32xf32>
    %173 = tpu.concatenate %170, %170, %170, %170 in 0 : vector<16x32xf32>, vector<16x32xf32>, vector<16x32xf32>, vector<16x32xf32> -> vector<64x32xf32>
    %174 = arith.mulf %173, %3 : vector<64x32xf32>
    %cst_86 = arith.constant dense<0.000000e+00> : vector<64x16xf32>
    %175 = tpu.matmul %174, %171, %cst_86 {dimension_numbers = #tpu.dot_dimension_numbers<[1], [1], [0], [0], [0, 0, 1, 0], [], []>} : vector<64x32xf32>, vector<16x32xf32>, vector<64x16xf32> -> vector<64x16xf32>
    %176 = arith.addf %175, %2 : vector<64x16xf32>
    %cst_87 = arith.constant dense<0xFF800000> : vector<64xf32>
    %177 = vector.multi_reduction <maximumf>, %176, %cst_87 [1] : vector<64x16xf32> to vector<64xf32>
    %178 = vector.shape_cast %177 : vector<64xf32> to vector<64x1xf32>
    %179 = vector.broadcast %178 : vector<64x1xf32> to vector<64x16xf32>
    %180 = arith.subf %176, %179 : vector<64x16xf32>
    %181 = math.exp %180 : vector<64x16xf32>
    %cst_88 = arith.constant dense<0.000000e+00> : vector<64xf32>
    %182 = vector.multi_reduction <add>, %181, %cst_88 [1] : vector<64x16xf32> to vector<64xf32>
    %183 = vector.shape_cast %182 : vector<64xf32> to vector<64x1xf32>
    %184 = tpu.reciprocal %183 {approx = true} : vector<64x1xf32> -> vector<64x1xf32>
    %185 = vector.broadcast %184 : vector<64x1xf32> to vector<64x16xf32>
    %186 = arith.mulf %181, %185 : vector<64x16xf32>
    %cst_89 = arith.constant dense<0.000000e+00> : vector<64x32xf32>
    %187 = tpu.matmul %186, %172, %cst_89 {dimension_numbers = #tpu.dot_dimension_numbers<[1], [0], [0], [1], [0, 0, 1, 1], [], []>} : vector<64x16xf32>, vector<16x32xf32>, vector<64x32xf32> -> vector<64x32xf32>
    %188 = arith.mulf %187, %3 : vector<64x32xf32>
    %189 = vector.extract_strided_slice %188 {offsets = [0, 0], sizes = [16, 32], strides = [1, 1]} : vector<64x32xf32> to vector<16x32xf32>
    %190 = vector.extract_strided_slice %188 {offsets = [16, 0], sizes = [16, 32], strides = [1, 1]} : vector<64x32xf32> to vector<16x32xf32>
    %191 = arith.addf %189, %190 : vector<16x32xf32>
    %192 = vector.extract_strided_slice %188 {offsets = [32, 0], sizes = [16, 32], strides = [1, 1]} : vector<64x32xf32> to vector<16x32xf32>
    %193 = arith.addf %191, %192 : vector<16x32xf32>
    %194 = vector.extract_strided_slice %188 {offsets = [48, 0], sizes = [16, 32], strides = [1, 1]} : vector<64x32xf32> to vector<16x32xf32>
    %195 = arith.addf %193, %194 : vector<16x32xf32>
    %cst_90 = arith.constant dense<0.000000e+00> : vector<16x32xf32>
    %196 = tpu.matmul %195, %139, %cst_90 {dimension_numbers = #tpu.dot_dimension_numbers<[1], [0], [0], [1], [0, 0, 1, 1], [], []>} : vector<16x32xf32>, vector<32x32xf32>, vector<16x32xf32> -> vector<16x32xf32>
    %197 = vector.broadcast %150 : vector<1x32xf32> to vector<16x32xf32>
    %198 = arith.addf %196, %197 : vector<16x32xf32>
    %cst_91 = arith.constant dense<0.000000e+00> : vector<16x32xf32>
    %199 = tpu.matmul %198, %147, %cst_91 {dimension_numbers = #tpu.dot_dimension_numbers<[1], [0], [0], [1], [0, 0, 1, 1], [], []>} : vector<16x32xf32>, vector<32x32xf32>, vector<16x32xf32> -> vector<16x32xf32>
    %200 = arith.addf %199, %166 : vector<16x32xf32>
    %cst_92 = arith.constant 0.000000e+00 : f32
    %201 = vector.broadcast %cst_92 : f32 to vector<16x32xf32>
    %202 = arith.maximumf %200, %201 : vector<16x32xf32>
    %203 = arith.addf %133, %202 : vector<16x32xf32>
    %cst_93 = arith.constant dense<0.000000e+00> : vector<16xf32>
    %204 = vector.multi_reduction <add>, %203, %cst_93 [1] : vector<16x32xf32> to vector<16xf32>
    %205 = vector.shape_cast %204 : vector<16xf32> to vector<16x1xf32>
    %cst_94 = arith.constant 3.200000e+01 : f32
    %206 = vector.broadcast %cst_94 : f32 to vector<16x1xf32>
    %207 = arith.divf %205, %206 : vector<16x1xf32>
    %208 = vector.broadcast %207 : vector<16x1xf32> to vector<16x32xf32>
    %209 = arith.subf %203, %208 : vector<16x32xf32>
    %210 = arith.mulf %209, %209 : vector<16x32xf32>
    %cst_95 = arith.constant dense<0.000000e+00> : vector<16xf32>
    %211 = vector.multi_reduction <add>, %210, %cst_95 [1] : vector<16x32xf32> to vector<16xf32>
    %212 = vector.shape_cast %211 : vector<16xf32> to vector<16x1xf32>
    %cst_96 = arith.constant 3.200000e+01 : f32
    %213 = vector.broadcast %cst_96 : f32 to vector<16x1xf32>
    %214 = arith.divf %212, %213 : vector<16x1xf32>
    %215 = vector.broadcast %207 : vector<16x1xf32> to vector<16x32xf32>
    %216 = arith.subf %203, %215 : vector<16x32xf32>
    %cst_97 = arith.constant 9.99999974E-6 : f32
    %217 = vector.broadcast %cst_97 : f32 to vector<16x1xf32>
    %218 = arith.addf %214, %217 : vector<16x1xf32>
    %219 = math.rsqrt %218 : vector<16x1xf32>
    %220 = vector.broadcast %219 : vector<16x1xf32> to vector<16x32xf32>
    %221 = arith.mulf %216, %220 : vector<16x32xf32>
    %222 = vector.broadcast %154 : vector<1x32xf32> to vector<16x32xf32>
    %223 = arith.mulf %221, %222 : vector<16x32xf32>
    %224 = vector.broadcast %155 : vector<1x32xf32> to vector<16x32xf32>
    %225 = arith.addf %223, %224 : vector<16x32xf32>
    %c1_98 = arith.constant 1 : index
    %c0_99 = arith.constant 0 : index
    %c0_100 = arith.constant 0 : index
    %226 = vector.load %arg10[%c1_98, %c0_99, %c0_100] : memref<2x32x64xf32, #tpu.memory_space<vmem>>, vector<1x32x64xf32>
    %227 = vector.shape_cast %226 : vector<1x32x64xf32> to vector<32x64xf32>
    %cst_101 = arith.constant dense<0.000000e+00> : vector<16x64xf32>
    %228 = tpu.matmul %225, %227, %cst_101 {dimension_numbers = #tpu.dot_dimension_numbers<[1], [0], [0], [1], [0, 0, 1, 1], [], []>} : vector<16x32xf32>, vector<32x64xf32>, vector<16x64xf32> -> vector<16x64xf32>
    %c1_102 = arith.constant 1 : index
    %c0_103 = arith.constant 0 : index
    %c0_104 = arith.constant 0 : index
    %229 = vector.load %arg11[%c1_102, %c0_103, %c0_104] : memref<2x1x64xf32, #tpu.memory_space<vmem>>, vector<1x1x64xf32>
    %230 = vector.shape_cast %229 : vector<1x1x64xf32> to vector<1x64xf32>
    %231 = vector.broadcast %230 : vector<1x64xf32> to vector<16x64xf32>
    %232 = arith.addf %228, %231 : vector<16x64xf32>
    %cst_105 = arith.constant 0.000000e+00 : f32
    %233 = vector.broadcast %cst_105 : f32 to vector<16x64xf32>
    %234 = arith.maximumf %232, %233 : vector<16x64xf32>
    %c1_106 = arith.constant 1 : index
    %c0_107 = arith.constant 0 : index
    %c0_108 = arith.constant 0 : index
    %235 = vector.load %arg12[%c1_106, %c0_107, %c0_108] : memref<2x64x32xf32, #tpu.memory_space<vmem>>, vector<1x64x32xf32>
    %236 = vector.shape_cast %235 : vector<1x64x32xf32> to vector<64x32xf32>
    %cst_109 = arith.constant dense<0.000000e+00> : vector<16x32xf32>
    %237 = tpu.matmul %234, %236, %cst_109 {dimension_numbers = #tpu.dot_dimension_numbers<[1], [0], [0], [1], [0, 0, 1, 1], [], []>} : vector<16x64xf32>, vector<64x32xf32>, vector<16x32xf32> -> vector<16x32xf32>
    %238 = vector.broadcast %156 : vector<1x32xf32> to vector<16x32xf32>
    %239 = arith.addf %237, %238 : vector<16x32xf32>
    %240 = arith.addf %225, %239 : vector<16x32xf32>
    %cst_110 = arith.constant dense<0.000000e+00> : vector<16xf32>
    %241 = vector.multi_reduction <add>, %240, %cst_110 [1] : vector<16x32xf32> to vector<16xf32>
    %242 = vector.shape_cast %241 : vector<16xf32> to vector<16x1xf32>
    %cst_111 = arith.constant 3.200000e+01 : f32
    %243 = vector.broadcast %cst_111 : f32 to vector<16x1xf32>
    %244 = arith.divf %242, %243 : vector<16x1xf32>
    %245 = vector.broadcast %244 : vector<16x1xf32> to vector<16x32xf32>
    %246 = arith.subf %240, %245 : vector<16x32xf32>
    %247 = arith.mulf %246, %246 : vector<16x32xf32>
    %cst_112 = arith.constant dense<0.000000e+00> : vector<16xf32>
    %248 = vector.multi_reduction <add>, %247, %cst_112 [1] : vector<16x32xf32> to vector<16xf32>
    %249 = vector.shape_cast %248 : vector<16xf32> to vector<16x1xf32>
    %cst_113 = arith.constant 3.200000e+01 : f32
    %250 = vector.broadcast %cst_113 : f32 to vector<16x1xf32>
    %251 = arith.divf %249, %250 : vector<16x1xf32>
    %252 = vector.broadcast %244 : vector<16x1xf32> to vector<16x32xf32>
    %253 = arith.subf %240, %252 : vector<16x32xf32>
    %cst_114 = arith.constant 9.99999974E-6 : f32
    %254 = vector.broadcast %cst_114 : f32 to vector<16x1xf32>
    %255 = arith.addf %251, %254 : vector<16x1xf32>
    %256 = math.rsqrt %255 : vector<16x1xf32>
    %257 = vector.broadcast %256 : vector<16x1xf32> to vector<16x32xf32>
    %258 = arith.mulf %253, %257 : vector<16x32xf32>
    %259 = vector.broadcast %154 : vector<1x32xf32> to vector<16x32xf32>
    %260 = arith.mulf %258, %259 : vector<16x32xf32>
    %261 = vector.broadcast %155 : vector<1x32xf32> to vector<16x32xf32>
    %262 = arith.addf %260, %261 : vector<16x32xf32>
    %c0_115 = arith.constant 0 : index
    %c0_116 = arith.constant 0 : index
    %263 = vector.load %arg13[%c0_115, %c0_116] : memref<32x16xf32, #tpu.memory_space<vmem>>, vector<32x16xf32>
    %cst_117 = arith.constant dense<0.000000e+00> : vector<16x16xf32>
    %264 = tpu.matmul %262, %263, %cst_117 {dimension_numbers = #tpu.dot_dimension_numbers<[1], [0], [0], [1], [0, 0, 1, 1], [], []>} : vector<16x32xf32>, vector<32x16xf32>, vector<16x16xf32> -> vector<16x16xf32>
    %c0_118 = arith.constant 0 : index
    %c0_119 = arith.constant 0 : index
    %265 = vector.load %arg14[%c0_118, %c0_119] : memref<1x16xf32, #tpu.memory_space<vmem>>, vector<1x16xf32>
    %266 = vector.broadcast %265 : vector<1x16xf32> to vector<16x16xf32>
    %267 = arith.addf %264, %266 : vector<16x16xf32>
    %c0_120 = arith.constant 0 : index
    %c0_121 = arith.constant 0 : index
    %268 = vector.load %arg15[%c0_120, %c0_121] : memref<16x16xf32, #tpu.memory_space<vmem>>, vector<16x16xf32>
    tpu.vector_store %arg15[%c0_120, %c0_121], %267 {strides = array<i32>} : memref<16x16xf32, #tpu.memory_space<vmem>>, vector<16x16xf32>,
    return
  }
  func.func @transform_0(%arg0: i32) -> (i32, i32) {
    %c0_i32 = arith.constant 0 : i32
    %c0_i32_0 = arith.constant 0 : i32
    %c0_i32_1 = arith.constant 0 : i32
    return %c0_i32, %c0_i32_0 : i32, i32
  }
  func.func @transform_1(%arg0: i32) -> (i32, i32) {
    %c0_i32 = arith.constant 0 : i32
    %c0_i32_0 = arith.constant 0 : i32
    %c0_i32_1 = arith.constant 0 : i32
    return %c0_i32, %c0_i32_0 : i32, i32
  }
  func.func @transform_2(%arg0: i32) -> (i32, i32) {
    %c0_i32 = arith.constant 0 : i32
    %c0_i32_0 = arith.constant 0 : i32
    %c0_i32_1 = arith.constant 0 : i32
    return %c0_i32, %c0_i32_0 : i32, i32
  }
  func.func @transform_3(%arg0: i32) -> (i32, i32) {
    %c0_i32 = arith.constant 0 : i32
    %c0_i32_0 = arith.constant 0 : i32
    %c0_i32_1 = arith.constant 0 : i32
    return %c0_i32, %c0_i32_0 : i32, i32
  }
  func.func @transform_4(%arg0: i32) -> (i32, i32) {
    %c0_i32 = arith.constant 0 : i32
    %c0_i32_0 = arith.constant 0 : i32
    %c0_i32_1 = arith.constant 0 : i32
    return %c0_i32, %c0_i32_0 : i32, i32
  }
  func.func @transform_5(%arg0: i32) -> (i32, i32, i32) {
    %c0_i32 = arith.constant 0 : i32
    %c0_i32_0 = arith.constant 0 : i32
    %c0_i32_1 = arith.constant 0 : i32
    %c0_i32_2 = arith.constant 0 : i32
    return %c0_i32, %c0_i32_0, %c0_i32_1 : i32, i32, i32
  }
  func.func @transform_6(%arg0: i32) -> (i32, i32, i32) {
    %c0_i32 = arith.constant 0 : i32
    %c0_i32_0 = arith.constant 0 : i32
    %c0_i32_1 = arith.constant 0 : i32
    %c0_i32_2 = arith.constant 0 : i32
    return %c0_i32, %c0_i32_0, %c0_i32_1 : i32, i32, i32
  }
  func.func @transform_7(%arg0: i32) -> (i32, i32, i32) {
    %c0_i32 = arith.constant 0 : i32
    %c0_i32_0 = arith.constant 0 : i32
    %c0_i32_1 = arith.constant 0 : i32
    %c0_i32_2 = arith.constant 0 : i32
    return %c0_i32, %c0_i32_0, %c0_i32_1 : i32, i32, i32
  }
  func.func @transform_8(%arg0: i32) -> (i32, i32, i32) {
    %c0_i32 = arith.constant 0 : i32
    %c0_i32_0 = arith.constant 0 : i32
    %c0_i32_1 = arith.constant 0 : i32
    %c0_i32_2 = arith.constant 0 : i32
    return %c0_i32, %c0_i32_0, %c0_i32_1 : i32, i32, i32
  }
  func.func @transform_9(%arg0: i32) -> (i32, i32, i32) {
    %c0_i32 = arith.constant 0 : i32
    %c0_i32_0 = arith.constant 0 : i32
    %c0_i32_1 = arith.constant 0 : i32
    %c0_i32_2 = arith.constant 0 : i32
    return %c0_i32, %c0_i32_0, %c0_i32_1 : i32, i32, i32
  }
  func.func @transform_10(%arg0: i32) -> (i32, i32, i32) {
    %c0_i32 = arith.constant 0 : i32
    %c0_i32_0 = arith.constant 0 : i32
    %c0_i32_1 = arith.constant 0 : i32
    %c0_i32_2 = arith.constant 0 : i32
    return %c0_i32, %c0_i32_0, %c0_i32_1 : i32, i32, i32
  }
  func.func @transform_11(%arg0: i32) -> (i32, i32, i32) {
    %c0_i32 = arith.constant 0 : i32
    %c0_i32_0 = arith.constant 0 : i32
    %c0_i32_1 = arith.constant 0 : i32
    %c0_i32_2 = arith.constant 0 : i32
    return %c0_i32, %c0_i32_0, %c0_i32_1 : i32, i32, i32
  }
  func.func @transform_12(%arg0: i32) -> (i32, i32) {
    %c0_i32 = arith.constant 0 : i32
    %c0_i32_0 = arith.constant 0 : i32
    %c0_i32_1 = arith.constant 0 : i32
    return %c0_i32, %c0_i32_0 : i32, i32
  }
  func.func @transform_13(%arg0: i32) -> (i32, i32) {
    %c0_i32 = arith.constant 0 : i32
    %c0_i32_0 = arith.constant 0 : i32
    %c0_i32_1 = arith.constant 0 : i32
    return %c0_i32, %c0_i32_0 : i32, i32
  }
  func.func @transform_14(%arg0: i32) -> (i32, i32) {
    %c0_i32 = arith.constant 0 : i32
    %c0_i32_0 = arith.constant 0 : i32
    %c0_i32_1 = arith.constant 0 : i32
    return %c0_i32, %c0_i32_0 : i32, i32
  }
}

</mosaic_0001>

<bundles_post_ra>
// kernel: tpu_custom_call.1
= control target key start
LH: loop header
LB: loop body
LE: loop exit
PB: predicated region body
PF: predicated region fallthrough
CT: control target
= control target key end

     0   :  { %19 = vsyncpa [#allocation3], 0  ;;  %s2349_s0 = inlined_call_operand.vmem [shape: f32[16,32], index: 0, kind: input, shape index: {}]   ;;  %s2350_s1 = inlined_call_operand.vmem [shape: f32[2,32], index: 1, kind: input, shape index: {}]   ;;  %s2351_s2 = inlined_call_operand.vmem [shape: f32[64,16], index: 2, kind: input, shape index: {}]   ;;  %s2352_s3 = inlined_call_operand.vmem [shape: f32[64,32], index: 3, kind: input, shape index: {}]   ;;  %s2353_s4 = inlined_call_operand.vmem [shape: f32[16,2], index: 4, kind: input, shape index: {}]   ;;  %s2354_s5 = inlined_call_operand.vmem [shape: f32[2,32,96], index: 5, kind: input, shape index: {}]   ;;  %s2355_s6 = inlined_call_operand.vmem [shape: f32[2,1,96], index: 6, kind: input, shape index: {}]   ;;  %s2356_s7 = inlined_call_operand.hbm [shape: f32[10,32,32], index: 7, kind: input, shape index: {}]   ;;  %s2357_s8 = inlined_call_operand.vmem [shape: f32[2,8,32], index: 8, kind: input, shape index: {}]   ;;  %s2358_s9 = inlined_call_operand.vmem [shape: f32[2,32,64], index: 9, kind: input, shape index: {}]   ;;  %s2359_s10 = inlined_call_operand.vmem [shape: f32[2,1,64], index: 10, kind: input, shape index: {}]   ;;  %s2360_s11 = inlined_call_operand.vmem [shape: f32[2,64,32], index: 11, kind: input, shape index: {}]   ;;  %s2361_s12 = inlined_call_operand.vmem [shape: f32[32,16], index: 12, kind: input, shape index: {}]   ;;  %s2362_s13 = inlined_call_operand.vmem [shape: f32[1,16], index: 13, kind: input, shape index: {}]   ;;  %s2363_s14 = inlined_call_operand.hbm [shape: f32[16,16], index: 14, kind: output, shape index: {}]  }
   0x1   :  { %20 = vsyncpa [#allocation4], 0  ;;  %s39_s15 = sshll.u32 %s2356_s7, 4  ;;  %s1730_s16 = smov [#allocation2]   ;;  %s40_s15 = int_to_ptr.hbm [resolvable:$true] %s39_s15 }
   0x2   :  { %s41_s17 = sshll.u32 %s1730_s16, 4  ;;  %s1731_s18 = smov 128   ;;  %s42_s17 = int_to_ptr.vmem [resolvable:$true] %s41_s17 }
   0x3   :  { %s1732_s19 = smov 8  }
   0x4   :  { %47 = dma.hbm_to_vmem [thread:$0]  %s40_s15, 5120, %s42_s17, [#allocation3], %s1731_s18, %s1731_s18, %s1732_s19  }
   0x5   :  { %1726 = dma.done.wait [#allocation3], 5120  }
   0x6   :  { %1727 = vsyncadd [#allocation3], 4294962176  ;;  %v98_v0 = vld [vmem:[#allocation2 + $0x38] sm:$0xff]  ;;  %v97_v1 = vld [vmem:[#allocation2 + $0x30] sm:$0xff]  ;;  %vm116_vm0 = vcmask 261120   ;;  %vm195_vm1 = vcmask 1041408  }
   0x7   :  { %132 = vmatpush.msra.mxu0 %v98_v0  ;;  %v96_v2 = vld [vmem:[#allocation2 + $0x28] sm:$0xff]  ;;  %v95_v3 = vld [vmem:[#allocation2 + $0x20] sm:$0xff]  ;;  %v103_v5 = vld [vmem:[#allocation2 + $0x58] sm:$0xff]  ;;  %vm337_vm2 = vcmask 130048   ;;  %vm188_vm3 = vcmask 15360   ;;  %vm679_vm11 = vcmask 523264  }
   0x8   :  { %v1821_v4 = vld [vmem:[%s2350_s1] sm:$0x3]  ;;  %v102_v6 = vld [vmem:[#allocation2 + $0x50] sm:$0xff]  ;;  %v101_v7 = vld [vmem:[#allocation2 + $0x48] sm:$0xff]  ;;  %s1464_s28 = sshll.u32 %s2363_s14, 4  ;;  %s1465_s28 = int_to_ptr.hbm [resolvable:$true] %s1464_s28 }
   0x9   :  { %133 = vmatpush.msra.mxu0 %v97_v1  ;;  %v100_v8 = vld [vmem:[#allocation2 + $0x40] sm:$0xff]  ;;  %v108_v9 = vld [vmem:[#allocation2 + $0x78] sm:$0xff]  ;;  %v107_v10 = vld [vmem:[#allocation2 + $0x70] sm:$0xff] }
   0xa   :  { %v1828_v11 = vld [vmem:[%s2357_s8] sm:$0xff]  ;;  %v106_v15 = vld [vmem:[#allocation2 + $0x68] sm:$0xff]  ;;  %v88_v17 = vld [vmem:[%s2354_s5 + $0x18] sm:$0xff] }
   0xb   :  { %134 = vmatpush.msra.mxu0 %v96_v2  ;;  %v115_v12 = vperm.slane %v1828_v11, 1  ;;  %v105_v16 = vld [vmem:[#allocation2 + $0x60] sm:$0xff]  ;;  %v87_v18 = vld [vmem:[%s2354_s5 + $0x10] sm:$0xff]  ;;  %v86_v19 = vld [vmem:[%s2354_s5 + $0x8] sm:$0xff]  ;;  %v140_v21 = vperm.slane %v1828_v11, 2  ;;  %v164_v26 = vperm.slane %v1828_v11, 3 }
   0xc   :  { %v85_v20 = vld [vmem:[%s2354_s5] sm:$0xff]  ;;  %v1856_v25 = vld [vmem:[%s2349_s0 + $0x8] sm:$0xff]  ;;  %v1896_v41 = vld [vmem:[%s2352_s3 + $0x10] sm:$0xff] }
   0xd   :  { %135 = vmatpush.msra.mxu0 %v95_v3  ;;  %v1849_v24 = vld [vmem:[%s2349_s0] sm:$0xff]  ;;  %s1733_s0 = smov 96   ;;  %v1888_v39 = vld [vmem:[%s2352_s3 + $0x8] sm:$0xff]  ;;  %v1904_v43 = vld [vmem:[%s2352_s3 + $0x18] sm:$0xff] }
   0xe   :  { %1477 = vmatmul.msk.f32.vlgmr.msra.gmra.mxu0 %vm116_vm0, %v1821_v4  ;;  %v1583_v30 = vld [vmem:[%s2355_s6] ss:$0 sm:$0xff]  ;;  %v1920_v47 = vld [vmem:[%s2352_s3 + $0x28] sm:$0xff]  ;;  %v1928_v49 = vld [vmem:[%s2352_s3 + $0x30] sm:$0xff] }
   0xf   :  { %156 = vmatpush.msrb.mxu0 %v103_v5  ;;  %v1879_v36 = vld [vmem:[%s2352_s3] sm:$0xff]  ;;  %v1936_v51 = vld [vmem:[%s2352_s3 + $0x38] sm:$0xff]  ;;  %v1951_v57 = vld [vmem:[%s2351_s2 + $0x8] sm:$0xff] }
  0x10   :  { %v1912_v45 = vld [vmem:[%s2352_s3 + $0x20] sm:$0xff]  ;;  %v1958_v61 = vld [vmem:[%s2351_s2 + $0x10] sm:$0xff]  ;;  %v1965_v1 = vld [vmem:[%s2351_s2 + $0x18] sm:$0xff] }
  0x11   :  { %157 = vmatpush.msrb.mxu0 %v102_v6  ;;  %v1944_v53 = vld [vmem:[%s2351_s2] sm:$0xff] }
  0x12   :  { %v1972_v6 = vld [vmem:[%s2351_s2 + $0x20] sm:$0xff] }
  0x13   :  { %158 = vmatpush.msrb.mxu0 %v101_v7 }
  0x15   :  { %159 = vmatpush.msrb.mxu0 %v100_v8 }
  0x17   :  { %180 = vmatpush.msra.mxu0 %v108_v9 }
  0x19   :  { %181 = vmatpush.msra.mxu0 %v107_v10  ;;  %v1979_v10 = vld [vmem:[%s2351_s2 + $0x28] sm:$0xff] }
  0x1b   :  { %182 = vmatpush.msra.mxu0 %v106_v15  ;;  %v1989_v15 = vld [vmem:[%s2351_s2 + $0x30] sm:$0xff] }
  0x1d   :  { %183 = vmatpush.msra.mxu0 %v105_v16 }
  0x8b   :  { %v137_v13 = vpop.f32.mrf.mxu0 }
  0x8c   :  { %v138_v14 = vadd.f32 %v137_v13, %v115_v12 }
  0x8e   :  { %1478 = vmatmul.msk.f32.vlgmr.msrb.gmra.mxu0 %vm116_vm0, %v138_v14 }
  0x8f   :  { %243 = vmatpush.msrb.mxu0 %v88_v17 }
  0x91   :  { %244 = vmatpush.msrb.mxu0 %v87_v18 }
  0x93   :  { %245 = vmatpush.msrb.mxu0 %v86_v19  ;;  %v1996_v19 = vld [vmem:[%s2351_s2 + $0x38] sm:$0xff]  ;;  %s1734_s2 = smov 64  }
  0x95   :  { %246 = vmatpush.msrb.mxu0 %v85_v20 }
 0x10b   :  { %v161_v22 = vpop.f32.mrf.mxu0 }
 0x10c   :  { %v162_v23 = vadd.f32 %v161_v22, %v140_v21 }
 0x10e   :  { %1479 = vmatmul.msk.f32.vlgmr.msra.gmra.mxu0 %vm116_vm0, %v162_v23 }
 0x116   :  { %1483 = vmatmul.msk.f32.vlgmr.msrb.gmra.mxu0 %vm116_vm0, %v1849_v24 }
 0x11e   :  { %1484 = vmatmul.msk.f32.gmra.mxu0 %vm116_vm0, %v1856_v25 }
 0x18b   :  { %v185_v27 = vpop.f32.mrf.mxu0 }
 0x18c   :  { %v186_v28 = vadd.f32 %v185_v27, %v164_v26 }
 0x18e   :  { %1480 = vmatpush.msk.msra.mxu3 %vm195_vm1, %v186_v28 }
 0x193   :  { %v248_v29 = vpop.f32.mrf.mxu0 }
 0x194   :  { %v1867_v33 = vadd.f32 %v1583_v30, %v248_v29 }
 0x196   :  { %v254_v38 = vmul.f32 %v1867_v33, %v1879_v36  ;;  %v256_v42 = vmul.f32 %v1867_v33, %v1896_v41  ;;  %v258_v46 = vmul.f32 %v1867_v33, %v1912_v45  ;;  %v260_v50 = vmul.f32 %v1867_v33, %v1928_v49 }
 0x19b   :  { %v251_v31 = vpop.f32.mrf.mxu0 }
 0x19c   :  { %v1865_v32 = vadd.f32 %v1583_v30, %v251_v31 }
 0x19e   :  { %266 = vrot.lane.b32.xlu0 %v1865_v32, %s1733_s0  ;;  %v1573_v34 = vpack.i.bf16 %v1867_v33, %v1865_v32  ;;  %v255_v40 = vmul.f32 %v1865_v32, %v1888_v39  ;;  %v257_v44 = vmul.f32 %v1865_v32, %v1904_v43  ;;  %v259_v48 = vmul.f32 %v1865_v32, %v1920_v47 }
 0x19f   :  { %v261_v52 = vmul.f32 %v1865_v32, %v1936_v51 }
 0x1a6   :  { %264 = vrot.lane.b32.xlu0 %v1867_v33, %s1733_s0 }
 0x210   :  { %v267_v35 = vpop.permute.xlu0 %266 }
 0x211   :  { %1485 = vmatpush.xpose.msk.msra.mxu1 %vm116_vm0, %v267_v35 }
 0x218   :  { %v265_v37 = vpop.permute.xlu0 %264 }
 0x219   :  { %1486 = vmatpush.xpose.msk.msra.mxu1 %vm116_vm0, %v265_v37 }
 0x21c   :  { %1487 = vmatmul.msk.f32.vlgmr.msra.gmra.mxu1 %vm116_vm0, %v254_v38 }
 0x224   :  { %1488 = vmatmul.msk.f32.gmra.mxu1 %vm116_vm0, %v255_v40 }
 0x22c   :  { %1489 = vmatmul.msk.f32.gmra.mxu1 %vm116_vm0, %v256_v42 }
 0x234   :  { %1490 = vmatmul.msk.f32.gmra.mxu1 %vm116_vm0, %v257_v44 }
 0x23c   :  { %1491 = vmatmul.msk.f32.gmra.mxu1 %vm116_vm0, %v258_v46 }
 0x244   :  { %1492 = vmatmul.msk.f32.gmra.mxu1 %vm116_vm0, %v259_v48 }
 0x24c   :  { %1493 = vmatmul.msk.f32.gmra.mxu1 %vm116_vm0, %v260_v50 }
 0x254   :  { %1494 = vmatmul.msk.f32.gmra.mxu1 %vm116_vm0, %v261_v52 }
 0x299   :  { %v313_v54 = vpop.f32.mrf.mxu1 }
 0x29a   :  { %v314_v55 = vadd.f32 %v313_v54, %v1944_v53 }
 0x29c   :  { %v338_v56 = vsel %vm337_vm2, %v314_v55, -inf }
 0x29d   :  { %339 = vmax.xlane.f32.xlu1 %v338_v56 }
 0x2a1   :  { %v316_v58 = vpop.f32.mrf.mxu1 }
 0x2a2   :  { %v317_v59 = vadd.f32 %v316_v58, %v1951_v57 }
 0x2a4   :  { %v341_v60 = vsel %vm337_vm2, %v317_v59, -inf }
 0x2a5   :  { %342 = vmax.xlane.f32.xlu1 %v341_v60 }
 0x2a9   :  { %v319_v62 = vpop.f32.mrf.mxu1 }
 0x2aa   :  { %v320_v63 = vadd.f32 %v319_v62, %v1958_v61 }
 0x2ac   :  { %v344_v0 = vsel %vm337_vm2, %v320_v63, -inf }
 0x2ad   :  { %345 = vmax.xlane.f32.xlu2 %v344_v0 }
 0x2b1   :  { %v322_v2 = vpop.f32.mrf.mxu1 }
 0x2b2   :  { %v323_v3 = vadd.f32 %v322_v2, %v1965_v1 }
 0x2b4   :  { %v347_v5 = vsel %vm337_vm2, %v323_v3, -inf }
 0x2b5   :  { %348 = vmax.xlane.f32.xlu2 %v347_v5 }
 0x2b9   :  { %v325_v7 = vpop.f32.mrf.mxu1 }
 0x2ba   :  { %v326_v8 = vadd.f32 %v325_v7, %v1972_v6 }
 0x2bc   :  { %v350_v9 = vsel %vm337_vm2, %v326_v8, -inf }
 0x2bd   :  { %351 = vmax.xlane.f32.xlu0 %v350_v9 }
 0x2c1   :  { %v328_v12 = vpop.f32.mrf.mxu1 }
 0x2c2   :  { %v1982_v13 = vadd.f32 %v328_v12, %v1979_v10 }
 0x2c4   :  { %v353_v14 = vsel %vm337_vm2, %v1982_v13, -inf }
 0x2c5   :  { %354 = vmax.xlane.f32.xlu1 %v353_v14 }
 0x2c9   :  { %v331_v16 = vpop.f32.mrf.mxu1 }
 0x2ca   :  { %v332_v17 = vadd.f32 %v331_v16, %v1989_v15 }
 0x2cc   :  { %v356_v18 = vsel %vm337_vm2, %v332_v17, -inf }
 0x2cd   :  { %357 = vmax.xlane.f32.xlu2 %v356_v18 }
 0x2d1   :  { %v334_v20 = vpop.f32.mrf.mxu1 }
 0x2d2   :  { %v335_v21 = vadd.f32 %v334_v20, %v1996_v19 }
 0x2d4   :  { %v359_v22 = vsel %vm337_vm2, %v335_v21, -inf }
 0x2d5   :  { %360 = vmax.xlane.f32.xlu2 %v359_v22 }
 0x310   :  { %v340_v23 = vpop.xlane.xlu1 %339 }
 0x311   :  { %v362_v26 = vsub.f32 %v314_v55, %v340_v23 }
 0x313   :  { %v370_v27 = vmul.f32 1.442695, %v362_v26 }
 0x315   :  { %1588 = vpow2.f32 %v370_v27 }
 0x318   :  { %v343_v28 = vpop.xlane.xlu1 %342 }
 0x319   :  { %v363_v29 = vsub.f32 %v317_v59, %v343_v28 }
 0x31b   :  { %v1589_v30 = vpop.eup %1588  ;;  %v372_v31 = vmul.f32 1.442695, %v363_v29 }
 0x31c   :  { %v386_v35 = vsel %vm337_vm2, %v1589_v30, 0.0 }
 0x31d   :  { %1590 = vpow2.f32 %v372_v31  ;;  %387 = vadd.xlane.f32.xlu1 %v386_v35 }
 0x320   :  { %v346_v37 = vpop.xlane.xlu2 %345 }
 0x321   :  { %v364_v38 = vsub.f32 %v320_v63, %v346_v37 }
 0x323   :  { %v1591_v40 = vpop.eup %1590  ;;  %v374_v42 = vmul.f32 1.442695, %v364_v38 }
 0x324   :  { %v389_v44 = vsel %vm337_vm2, %v1591_v40, 0.0 }
 0x325   :  { %1592 = vpow2.f32 %v374_v42  ;;  %390 = vadd.xlane.f32.xlu2 %v389_v44 }
 0x328   :  { %v349_v46 = vpop.xlane.xlu2 %348 }
 0x329   :  { %v365_v48 = vsub.f32 %v323_v3, %v349_v46 }
 0x32b   :  { %v1593_v50 = vpop.eup %1592  ;;  %v376_v52 = vmul.f32 1.442695, %v365_v48 }
 0x32c   :  { %v392_v54 = vsel %vm337_vm2, %v1593_v50, 0.0 }
 0x32d   :  { %1594 = vpow2.f32 %v376_v52  ;;  %393 = vadd.xlane.f32.xlu2 %v392_v54 }
 0x330   :  { %v352_v55 = vpop.xlane.xlu0 %351 }
 0x331   :  { %v366_v56 = vsub.f32 %v326_v8, %v352_v55 }
 0x333   :  { %v1595_v58 = vpop.eup %1594  ;;  %v378_v59 = vmul.f32 1.442695, %v366_v56 }
 0x334   :  { %v395_v60 = vsel %vm337_vm2, %v1595_v58, 0.0 }
 0x335   :  { %1596 = vpow2.f32 %v378_v59  ;;  %396 = vadd.xlane.f32.xlu2 %v395_v60 }
 0x336   :  { %1574 = vrot.lane.b32.xlu1 %v1573_v34, %s1734_s2 }
 0x338   :  { %v355_v9 = vpop.xlane.xlu1 %354 }
 0x339   :  { %v367_v32 = vsub.f32 %v1982_v13, %v355_v9  ;;  %v90_v9 = vld [vmem:[#allocation2] sm:$0xff] }
 0x33b   :  { %v1597_v62 = vpop.eup %1596  ;;  %v380_v33 = vmul.f32 1.442695, %v367_v32 }
 0x33c   :  { %v398_v63 = vsel %vm337_vm2, %v1597_v62, 0.0 }
 0x33d   :  { %399 = vadd.xlane.f32.xlu2 %v398_v63  ;;  %v2024_v63 = vld [vmem:[%s2353_s4] sm:$0xff] }
 0x33e   :  { %1481 = vmatmul.msk.f32.vlgmr.msra.gmra.mxu3 %vm188_vm3, %v2024_v63 }
 0x340   :  { %v358_v0 = vpop.xlane.xlu2 %357 }
 0x341   :  { %v368_v2 = vsub.f32 %v332_v17, %v358_v0 }
 0x343   :  { %v382_v3 = vmul.f32 1.442695, %v368_v2  ;;  %v2031_v2 = vld [vmem:[%s2353_s4 + $0x8] sm:$0xff] }
 0x345   :  { %1598 = vpow2.f32 %v382_v3  ;;  %v93_v3 = vld [vmem:[#allocation2 + $0x18] sm:$0xff] }
 0x346   :  { %1482 = vmatmul.msk.f32.gmra.mxu3 %vm188_vm3, %v2031_v2 }
 0x347   :  { %530 = vmatpush.msrb.mxu3 %v93_v3 }
 0x348   :  { %v361_v5 = vpop.xlane.xlu2 %360 }
 0x349   :  { %v369_v7 = vsub.f32 %v335_v21, %v361_v5 }
 0x34b   :  { %v1599_v8 = vpop.eup %1598  ;;  %v384_v12 = vmul.f32 1.442695, %v369_v7  ;;  %v92_v7 = vld [vmem:[#allocation2 + $0x10] sm:$0xff] }
 0x34c   :  { %v404_v14 = vsel %vm337_vm2, %v1599_v8, 0.0  ;;  %531 = vmatpush.msrb.mxu3 %v92_v7 }
 0x34d   :  { %1600 = vpow2.f32 %v384_v12  ;;  %405 = vadd.xlane.f32.xlu0 %v404_v14 }
 0x34e   :  { %1602 = vpow2.f32 %v380_v33 }
 0x353   :  { %v1601_v34 = vpop.eup %1600 }
 0x354   :  { %v407_v16 = vsel %vm337_vm2, %v1601_v34, 0.0  ;;  %v1603_v17 = vpop.eup %1602 }
 0x355   :  { %408 = vadd.xlane.f32.xlu2 %v407_v16  ;;  %v401_v18 = vsel %vm337_vm2, %v1603_v17, 0.0 }
 0x360   :  { %402 = vadd.xlane.f32.xlu1 %v401_v18 }
 0x390   :  { %v388_v20 = vpop.xlane.xlu1 %387 }
 0x391   :  { %1604 = vrcp.f32 %v388_v20 }
 0x397   :  { %v1605_v23 = vpop.eup %1604 }
 0x398   :  { %v391_v21 = vpop.xlane.xlu2 %390  ;;  %v418_v28 = vmul.f32 %v1605_v23, %v1589_v30 }
 0x399   :  { %1606 = vrcp.f32 %v391_v21 }
 0x39f   :  { %v1607_v29 = vpop.eup %1606 }
 0x3a0   :  { %v394_v13 = vpop.xlane.xlu2 %393  ;;  %v419_v31 = vmul.f32 %v1607_v29, %v1591_v40 }
 0x3a1   :  { %1608 = vrcp.f32 %v394_v13 }
 0x3a7   :  { %v1609_v37 = vpop.eup %1608 }
 0x3a8   :  { %v1575_v22 = vpop.permute.xlu1 %1574  ;;  %v397_v35 = vpop.xlane.xlu2 %396  ;;  %v420_v38 = vmul.f32 %v1609_v37, %v1593_v50  ;;  %v113_v37 = vld [vmem:[#allocation2 + $0x98] sm:$0xff] }
 0x3a9   :  { %v1576_v26 = vunpack.i.l.bf16 %v1575_v22  ;;  %v1577_v27 = vunpack.i.h.bf16 %v1575_v22  ;;  %1610 = vrcp.f32 %v397_v35  ;;  %559 = vmatpush.msra.mxu0 %v113_v37 }
 0x3ab   :  { %470 = vmatpush.msra.mxu2 %v1576_v26 }
 0x3ad   :  { %471 = vmatpush.msra.mxu2 %v1577_v27 }
 0x3ae   :  { %1495 = vmatmul.msk.f32.vlgmr.msra.gmra.mxu2 %vm337_vm2, %v418_v28 }
 0x3af   :  { %v1611_v44 = vpop.eup %1610 }
 0x3b0   :  { %v400_v42 = vpop.xlane.xlu2 %399  ;;  %v421_v46 = vmul.f32 %v1611_v44, %v1595_v58  ;;  %v110_v44 = vld [vmem:[#allocation2 + $0x80] sm:$0xff] }
 0x3b1   :  { %1612 = vrcp.f32 %v400_v42  ;;  %v111_v42 = vld [vmem:[#allocation2 + $0x88] sm:$0xff] }
 0x3b6   :  { %1496 = vmatmul.msk.f32.gmra.mxu2 %vm337_vm2, %v419_v31 }
 0x3b7   :  { %v1613_v30 = vpop.eup %1612 }
 0x3b8   :  { %v422_v48 = vmul.f32 %v1613_v30, %v1597_v62 }
 0x3be   :  { %1497 = vmatmul.msk.f32.gmra.mxu2 %vm337_vm2, %v420_v38  ;;  %v112_v38 = vld [vmem:[#allocation2 + $0x90] sm:$0xff] }
 0x3bf   :  { %560 = vmatpush.msra.mxu0 %v112_v38  ;;  %v677_v38 = vld [vmem:[%s2360_s11 + $0x38] sm:$0xff] }
 0x3c0   :  { %v406_v40 = vpop.xlane.xlu0 %405 }
 0x3c1   :  { %561 = vmatpush.msra.mxu0 %v111_v42  ;;  %v676_v42 = vld [vmem:[%s2360_s11 + $0x30] sm:$0xff] }
 0x3c3   :  { %562 = vmatpush.msra.mxu0 %v110_v44  ;;  %v675_v44 = vld [vmem:[%s2360_s11 + $0x28] sm:$0xff] }
 0x3c5   :  { %694 = vmatpush.msrb.mxu0 %v677_v38 }
 0x3c6   :  { %1498 = vmatmul.msk.f32.gmra.mxu2 %vm337_vm2, %v421_v46  ;;  %v216_v46 = vpop.f32.mrf.mxu3 }
 0x3c7   :  { %695 = vmatpush.msrb.mxu0 %v676_v42  ;;  %v678_v42 = vperm.slane %v1828_v11, 6 }
 0x3c8   :  { %v409_v50 = vpop.xlane.xlu2 %408 }
 0x3c9   :  { %696 = vmatpush.msrb.mxu0 %v675_v44 }
 0x3ce   :  { %1499 = vmatmul.msk.f32.gmra.mxu2 %vm337_vm2, %v422_v48  ;;  %v219_v30 = vpop.f32.mrf.mxu3  ;;  %v511_v48 = vperm.slane %v1828_v11, 0 }
 0x3d3   :  { %v403_v52 = vpop.xlane.xlu1 %402 }
 0x3d4   :  { %1614 = vrcp.f32 %v403_v52 }
 0x3d5   :  { %1616 = vrcp.f32 %v406_v40 }
 0x3d6   :  { %1618 = vrcp.f32 %v409_v50 }
 0x3da   :  { %v1615_v54 = vpop.eup %1614 }
 0x3db   :  { %v423_v55 = vmul.f32 %v1615_v54, %v1603_v17  ;;  %v1617_v56 = vpop.eup %1616 }
 0x3dc   :  { %v424_v59 = vmul.f32 %v1617_v56, %v1599_v8  ;;  %v1619_v58 = vpop.eup %1618  ;;  %v91_v8 = vld [vmem:[#allocation2 + $0x8] sm:$0xff] }
 0x3dd   :  { %1500 = vmatmul.msk.f32.gmra.mxu2 %vm337_vm2, %v423_v55  ;;  %v425_v60 = vmul.f32 %v1619_v58, %v1601_v34  ;;  %532 = vmatpush.msrb.mxu3 %v91_v8  ;;  %v1735_v8 = vmov 32.0  }
 0x3de   :  { %1620 = vrcp.f32 %v1735_v8  ;;  %v2091_v8 = vperm.slane %v1828_v11, 5 }
 0x3df   :  { %533 = vmatpush.msrb.mxu3 %v90_v9 }
 0x3e4   :  { %v1621_v9 = vpop.eup %1620 }
 0x3e5   :  { %1501 = vmatmul.msk.f32.gmra.mxu2 %vm337_vm2, %v424_v59  ;;  %vm585_vm4 = vweird.f32 %v1621_v9 }
 0x3ed   :  { %1502 = vmatmul.msk.f32.gmra.mxu2 %vm337_vm2, %v425_v60 }
 0x431   :  { %v473_v62 = vpop.f32.mrf.mxu2 }
 0x432   :  { %v497_v34 = vmul.f32 %v473_v62, %v1879_v36 }
 0x439   :  { %v476_v0 = vpop.f32.mrf.mxu2 }
 0x43a   :  { %v498_v26 = vmul.f32 %v476_v0, %v1888_v39 }
 0x441   :  { %v479_v5 = vpop.f32.mrf.mxu2 }
 0x442   :  { %v499_v33 = vmul.f32 %v479_v5, %v1896_v41 }
 0x444   :  { %v505_v17 = vadd.f32 %v499_v33, %v497_v34 }
 0x449   :  { %v482_v12 = vpop.f32.mrf.mxu2 }
 0x44a   :  { %v500_v22 = vmul.f32 %v482_v12, %v1904_v43  ;;  %v581_v12 = vmul.f32 32.0, %v1621_v9 }
 0x44c   :  { %v506_v13 = vadd.f32 %v500_v22, %v498_v26 }
 0x451   :  { %v485_v14 = vpop.f32.mrf.mxu2 }
 0x452   :  { %v501_v16 = vmul.f32 %v485_v14, %v1912_v45  ;;  %v582_v14 = vsub.f32 1.0, %v581_v12 }
 0x454   :  { %v507_v20 = vadd.f32 %v505_v17, %v501_v16 }
 0x460   :  { %v488_v32 = vpop.f32.mrf.mxu2 }
 0x461   :  { %v502_v27 = vmul.f32 %v488_v32, %v1920_v47  ;;  %v583_v32 = vmul.f32 %v1621_v9, %v582_v14 }
 0x463   :  { %v508_v29 = vadd.f32 %v506_v13, %v502_v27  ;;  %v584_v33 = vadd.f32 %v1621_v9, %v583_v32  ;;  %v634_v27 = vld [vmem:[%s2358_s9 + $0x18] sm:$0xff]  ;;  %v633_v13 = vld [vmem:[%s2358_s9 + $0x10] sm:$0xff] }
 0x464   :  { %657 = vmatpush.msra.mxu3 %v634_v27  ;;  %v772_v27 = vld [vmem:[#allocation2 + $0xc0] sm:$0xff] }
 0x466   :  { %658 = vmatpush.msra.mxu3 %v633_v13  ;;  %v1584_v13 = vld [vmem:[%s2359_s10] ss:$0 sm:$0xff] }
 0x468   :  { %v491_v18 = vpop.f32.mrf.mxu2 }
 0x469   :  { %v503_v21 = vmul.f32 %v491_v18, %v1928_v49 }
 0x46b   :  { %v509_v23 = vadd.f32 %v507_v20, %v503_v21 }
 0x46d   :  { %1503 = vmatmul.msk.f32.vlgmr.msrb.gmra.mxu3 %vm116_vm0, %v509_v23 }
 0x470   :  { %v494_v28 = vpop.f32.mrf.mxu2 }
 0x471   :  { %v504_v31 = vmul.f32 %v494_v28, %v1936_v51  ;;  %v632_v28 = vld [vmem:[%s2358_s9 + $0x8] sm:$0xff] }
 0x472   :  { %659 = vmatpush.msra.mxu3 %v632_v28 }
 0x473   :  { %v510_v35 = vadd.f32 %v508_v29, %v504_v31  ;;  %v631_v29 = vld [vmem:[%s2358_s9] sm:$0xff] }
 0x474   :  { %660 = vmatpush.msra.mxu3 %v631_v29 }
 0x475   :  { %1504 = vmatmul.msk.f32.gmra.mxu3 %vm116_vm0, %v510_v35 }
 0x4f0   :  { %v535_v52 = vpop.f32.mrf.mxu3 }
 0x4f1   :  { %v536_v40 = vadd.f32 %v535_v52, %v511_v48 }
 0x4f3   :  { %1505 = vmatmul.msk.f32.vlgmr.msra.gmra.mxu0 %vm116_vm0, %v536_v40 }
 0x4f8   :  { %v538_v54 = vpop.f32.mrf.mxu3 }
 0x4f9   :  { %v539_v55 = vadd.f32 %v538_v54, %v511_v48  ;;  %v674_v48 = vld [vmem:[%s2360_s11 + $0x20] sm:$0xff]  ;;  %v673_v54 = vld [vmem:[%s2360_s11 + $0x18] sm:$0xff] }
 0x4fa   :  { %697 = vmatpush.msrb.mxu0 %v674_v48 }
 0x4fb   :  { %1506 = vmatmul.msk.f32.gmra.mxu0 %vm116_vm0, %v539_v55 }
 0x4fc   :  { %698 = vmatpush.msrb.mxu0 %v673_v54 }
 0x570   :  { %v564_v50 = vpop.f32.mrf.mxu0 }
 0x571   :  { %v565_v56 = vadd.f32 %v564_v50, %v216_v46 }
 0x573   :  { %v570_v59 = vmax.f32 %v565_v56, 0.0 }
 0x575   :  { %v572_v58 = vadd.f32 %v570_v59, %v1849_v24  ;;  %v2052_v24 = vsel %vm585_vm4, %v1621_v9, %v584_v33 }
 0x577   :  { %v574_v60 = vsel %vm116_vm0, %v572_v58, 0.0 }
 0x578   :  { %575 = vadd.xlane.f32.xlu0 %v574_v60  ;;  %v567_v62 = vpop.f32.mrf.mxu0 }
 0x579   :  { %v568_v0 = vadd.f32 %v567_v62, %v219_v30 }
 0x57b   :  { %v571_v3 = vmax.f32 %v568_v0, 0.0  ;;  %v2088_v0 = vperm.slane %v1828_v11, 4 }
 0x57d   :  { %v573_v5 = vadd.f32 %v571_v3, %v1856_v25 }
 0x57f   :  { %v577_v7 = vsel %vm116_vm0, %v573_v5, 0.0 }
 0x580   :  { %578 = vadd.xlane.f32.xlu2 %v577_v7 }
 0x5eb   :  { %v576_v34 = vpop.xlane.xlu0 %575 }
 0x5ec   :  { %v587_v16 = vmul.f32 %v2052_v24, %v576_v34 }
 0x5ee   :  { %v589_v17 = vsub.f32 %v572_v58, %v587_v16 }
 0x5f0   :  { %v591_v18 = vmul.f32 %v589_v17, %v589_v17 }
 0x5f2   :  { %v593_v25 = vsel %vm116_vm0, %v591_v18, 0.0 }
 0x5f3   :  { %594 = vadd.xlane.f32.xlu0 %v593_v25  ;;  %v579_v20 = vpop.xlane.xlu2 %578  ;;  %v672_v25 = vld [vmem:[%s2360_s11 + $0x10] sm:$0xff] }
 0x5f4   :  { %v588_v21 = vmul.f32 %v2052_v24, %v579_v20  ;;  %699 = vmatpush.msrb.mxu0 %v672_v25  ;;  %v671_v20 = vld [vmem:[%s2360_s11 + $0x8] sm:$0xff] }
 0x5f6   :  { %v590_v22 = vsub.f32 %v573_v5, %v588_v21  ;;  %700 = vmatpush.msrb.mxu0 %v671_v20  ;;  %v670_v21 = vld [vmem:[%s2360_s11] sm:$0xff]  ;;  %v783_v20 = vld [vmem:[#allocation2 + $0x108] sm:$0xff] }
 0x5f8   :  { %v592_v23 = vmul.f32 %v590_v22, %v590_v22  ;;  %701 = vmatpush.msrb.mxu0 %v670_v21 }
 0x5fa   :  { %v596_v26 = vsel %vm116_vm0, %v592_v23, 0.0  ;;  %v774_v23 = vld [vmem:[#allocation2 + $0xd0] sm:$0xff] }
 0x5fb   :  { %597 = vadd.xlane.f32.xlu2 %v596_v26  ;;  %v773_v26 = vld [vmem:[#allocation2 + $0xc8] sm:$0xff] }
 0x666   :  { %v595_v31 = vpop.xlane.xlu0 %594 }
 0x667   :  { %v599_v35 = vmul.f32 %v595_v31, %v2052_v24 }
 0x669   :  { %v601_v37 = vadd.f32 1e-05, %v599_v35 }
 0x66b   :  { %1622 = vrsqrt.f32 %v601_v37  ;;  %vm609_vm6 = vweird.f32 %v601_v37 }
 0x66e   :  { %v598_v46 = vpop.xlane.xlu2 %597 }
 0x66f   :  { %v600_v30 = vmul.f32 %v598_v46, %v2052_v24 }
 0x671   :  { %v1623_v52 = vpop.eup %1622  ;;  %v602_v40 = vadd.f32 1e-05, %v600_v30 }
 0x672   :  { %v604_v55 = vmul.f32 %v1623_v52, %v601_v37  ;;  %vm610_vm5 = vweird.f32 %v1623_v52 }
 0x673   :  { %1624 = vrsqrt.f32 %v602_v40  ;;  %vm611_vm7 = vmor %vm609_vm6, %vm610_vm5  ;;  %vm619_vm9 = vweird.f32 %v602_v40 }
 0x674   :  { %v605_v50 = vmul.f32 %v1623_v52, %v604_v55  ;;  %v780_v55 = vld [vmem:[#allocation2 + $0xf8] sm:$0xff] }
 0x676   :  { %v606_v56 = vmul.f32 0.5, %v605_v50  ;;  %v779_v50 = vld [vmem:[#allocation2 + $0xf0] sm:$0xff] }
 0x678   :  { %v607_v59 = vsub.f32 1.5, %v606_v56  ;;  %v2121_v56 = vld [vmem:[%s2357_s8 + $0x8] sm:$0xff] }
 0x679   :  { %v1625_v58 = vpop.eup %1624  ;;  %v793_v11 = vperm.slane %v2121_v56, 1  ;;  %v814_v25 = vperm.slane %v2121_v56, 2 }
 0x67a   :  { %v608_v60 = vmul.f32 %v1623_v52, %v607_v59  ;;  %v614_v62 = vmul.f32 %v1625_v58, %v602_v40  ;;  %vm620_vm8 = vweird.f32 %v1625_v58 }
 0x67b   :  { %vm621_vm10 = vmor %vm619_vm9, %vm620_vm8 }
 0x67c   :  { %v612_v3 = vsel %vm611_vm7, %v1623_v52, %v608_v60  ;;  %v615_v5 = vmul.f32 %v1625_v58, %v614_v62  ;;  %v777_v62 = vld [vmem:[#allocation2 + $0xe0] sm:$0xff] }
 0x67d   :  { %v623_v7 = vmul.f32 %v612_v3, %v589_v17 }
 0x67e   :  { %v616_v9 = vmul.f32 0.5, %v615_v5 }
 0x67f   :  { %v626_v12 = vmul.f32 %v2088_v0, %v623_v7 }
 0x680   :  { %v617_v14 = vsub.f32 1.5, %v616_v9 }
 0x681   :  { %v629_v32 = vadd.f32 %v2091_v8, %v626_v12 }
 0x682   :  { %v618_v33 = vmul.f32 %v1625_v58, %v617_v14 }
 0x683   :  { %1507 = vmatmul.msk.f32.vlgmr.msra.gmra.mxu3 %vm116_vm0, %v629_v32 }
 0x684   :  { %v622_v34 = vsel %vm621_vm10, %v1625_v58, %v618_v33  ;;  %v778_v58 = vld [vmem:[#allocation2 + $0xe8] sm:$0xff] }
 0x685   :  { %v624_v16 = vmul.f32 %v622_v34, %v590_v22  ;;  %v775_v22 = vld [vmem:[#allocation2 + $0xd8] sm:$0xff] }
 0x686   :  { %806 = vmatpush.msrb.mxu3 %v775_v22 }
 0x687   :  { %v627_v18 = vmul.f32 %v2088_v0, %v624_v16 }
 0x688   :  { %807 = vmatpush.msrb.mxu3 %v774_v23  ;;  %v782_v23 = vld [vmem:[#allocation2 + $0x100] sm:$0xff] }
 0x689   :  { %v630_v17 = vadd.f32 %v2091_v8, %v627_v18  ;;  %v785_v18 = vld [vmem:[#allocation2 + $0x118] sm:$0xff] }
 0x68a   :  { %808 = vmatpush.msrb.mxu3 %v773_v26  ;;  %854 = vmatpush.msra.mxu0 %v785_v18  ;;  %v1514_v26 = vld [vmem:[%s2354_s5 + $0x38] sm:$0xff] }
 0x68b   :  { %1508 = vmatmul.msk.f32.gmra.mxu3 %vm116_vm0, %v630_v17 }
 0x68c   :  { %809 = vmatpush.msrb.mxu3 %v772_v27  ;;  %v1513_v27 = vld [vmem:[%s2354_s5 + $0x30] sm:$0xff] }
 0x68e   :  { %830 = vmatpush.msra.mxu3 %v780_v55 }
 0x690   :  { %831 = vmatpush.msra.mxu3 %v779_v50 }
 0x692   :  { %832 = vmatpush.msra.mxu3 %v778_v58 }
 0x693   :  { %1517 = vmatmul.msk.f32.vlgmr.msrb.gmra.mxu3 %vm116_vm0, %v1821_v4 }
 0x694   :  { %833 = vmatpush.msra.mxu3 %v777_v62 }
 0x706   :  { %v662_v28 = vpop.f32.mrf.mxu3 }
 0x707   :  { %v663_v29 = vadd.f32 %v1584_v13, %v662_v28  ;;  %v1511_v28 = vld [vmem:[%s2354_s5 + $0x20] sm:$0xff] }
 0x709   :  { %v668_v31 = vmax.f32 %v663_v29, 0.0 }
 0x70b   :  { %1509 = vmatmul.msk.f32.vlgmr.msrb.gmra.mxu0 %vm679_vm11, %v668_v31 }
 0x70e   :  { %v665_v35 = vpop.f32.mrf.mxu3 }
 0x70f   :  { %v666_v37 = vadd.f32 %v1584_v13, %v665_v35  ;;  %v1512_v13 = vld [vmem:[%s2354_s5 + $0x28] sm:$0xff] }
 0x711   :  { %v669_v38 = vmax.f32 %v666_v37, 0.0 }
 0x713   :  { %1510 = vmatmul.msk.f32.gmra.mxu0 %vm679_vm11, %v669_v38 }
 0x716   :  { %v811_v59 = vpop.f32.mrf.mxu3 }
 0x717   :  { %v812_v60 = vadd.f32 %v811_v59, %v793_v11 }
 0x719   :  { %1518 = vmatmul.msk.f32.vlgmr.msra.gmra.mxu3 %vm116_vm0, %v812_v60 }
 0x788   :  { %v703_v44 = vpop.f32.mrf.mxu0 }
 0x789   :  { %v704_v46 = vadd.f32 %v703_v44, %v678_v42 }
 0x78b   :  { %v709_v4 = vadd.f32 %v704_v46, %v629_v32 }
 0x78d   :  { %v711_v30 = vsel %vm116_vm0, %v709_v4, 0.0 }
 0x78e   :  { %712 = vadd.xlane.f32.xlu0 %v711_v30 }
 0x790   :  { %v706_v48 = vpop.f32.mrf.mxu0 }
 0x791   :  { %v707_v52 = vadd.f32 %v706_v48, %v678_v42 }
 0x793   :  { %v710_v40 = vadd.f32 %v707_v52, %v630_v17  ;;  %v784_v17 = vld [vmem:[#allocation2 + $0x110] sm:$0xff] }
 0x794   :  { %855 = vmatpush.msra.mxu0 %v784_v17 }
 0x795   :  { %v714_v54 = vsel %vm116_vm0, %v710_v40, 0.0 }
 0x796   :  { %715 = vadd.xlane.f32.xlu2 %v714_v54  ;;  %856 = vmatpush.msra.mxu0 %v783_v20 }
 0x798   :  { %857 = vmatpush.msra.mxu0 %v782_v23 }
 0x79a   :  { %909 = vmatpush.msrb.mxu0 %v1514_v26 }
 0x79c   :  { %v835_v21 = vpop.f32.mrf.mxu3  ;;  %910 = vmatpush.msrb.mxu0 %v1513_v27 }
 0x79d   :  { %v836_v22 = vadd.f32 %v835_v21, %v814_v25 }
 0x79e   :  { %911 = vmatpush.msrb.mxu0 %v1512_v13 }
 0x79f   :  { %1519 = vmatmul.msk.f32.vlgmr.msra.gmra.mxu0 %vm116_vm0, %v836_v22 }
 0x7a0   :  { %912 = vmatpush.msrb.mxu0 %v1511_v28 }
 0x801   :  { %v713_v3 = vpop.xlane.xlu0 %712 }
 0x802   :  { %v717_v5 = vmul.f32 %v713_v3, %v2052_v24 }
 0x804   :  { %v719_v7 = vsub.f32 %v709_v4, %v717_v5 }
 0x806   :  { %v721_v9 = vmul.f32 %v719_v7, %v719_v7 }
 0x808   :  { %v723_v12 = vsel %vm116_vm0, %v721_v9, 0.0 }
 0x809   :  { %724 = vadd.xlane.f32.xlu0 %v723_v12  ;;  %v716_v14 = vpop.xlane.xlu2 %715 }
 0x80a   :  { %v718_v32 = vmul.f32 %v716_v14, %v2052_v24  ;;  %v838_v14 = vperm.slane %v2121_v56, 3 }
 0x80c   :  { %v720_v33 = vsub.f32 %v710_v40, %v718_v32 }
 0x80e   :  { %v722_v34 = vmul.f32 %v720_v33, %v720_v33 }
 0x810   :  { %v726_v16 = vsel %vm116_vm0, %v722_v34, 0.0 }
 0x811   :  { %727 = vadd.xlane.f32.xlu2 %v726_v16 }
 0x81c   :  { %v859_v32 = vpop.f32.mrf.mxu0 }
 0x81d   :  { %v860_v34 = vadd.f32 %v859_v32, %v838_v14 }
 0x81f   :  { %1520 = vmatpush.msk.msrb.mxu3 %vm195_vm1, %v860_v34 }
 0x820   :  { %1521 = vmatmul.msk.f32.vlgmr.msrb.gmra.mxu3 %vm188_vm3, %v2024_v63 }
 0x828   :  { %1522 = vmatmul.msk.f32.gmra.mxu3 %vm188_vm3, %v2031_v2 }
 0x87c   :  { %v725_v29 = vpop.xlane.xlu0 %724 }
 0x87d   :  { %v729_v31 = vmul.f32 %v725_v29, %v2052_v24 }
 0x87f   :  { %v731_v35 = vadd.f32 1e-05, %v729_v31 }
 0x881   :  { %1626 = vrsqrt.f32 %v731_v35  ;;  %vm739_vm13 = vweird.f32 %v731_v35 }
 0x884   :  { %v728_v37 = vpop.xlane.xlu2 %727 }
 0x885   :  { %v730_v38 = vmul.f32 %v728_v37, %v2052_v24 }
 0x887   :  { %v1627_v42 = vpop.eup %1626  ;;  %v732_v44 = vadd.f32 1e-05, %v730_v38 }
 0x888   :  { %v734_v46 = vmul.f32 %v1627_v42, %v731_v35  ;;  %vm740_vm12 = vweird.f32 %v1627_v42 }
 0x889   :  { %1628 = vrsqrt.f32 %v732_v44  ;;  %vm741_vm14 = vmor %vm739_vm13, %vm740_vm12  ;;  %vm749_vm4 = vweird.f32 %v732_v44 }
 0x88a   :  { %v735_v4 = vmul.f32 %v1627_v42, %v734_v46 }
 0x88c   :  { %v736_v30 = vmul.f32 0.5, %v735_v4 }
 0x88e   :  { %v737_v48 = vsub.f32 1.5, %v736_v30 }
 0x88f   :  { %v1629_v52 = vpop.eup %1628 }
 0x890   :  { %v738_v40 = vmul.f32 %v1627_v42, %v737_v48  ;;  %v744_v54 = vmul.f32 %v1629_v52, %v732_v44  ;;  %vm750_vm15 = vweird.f32 %v1629_v52 }
 0x891   :  { %vm751_vm5 = vmor %vm749_vm4, %vm750_vm15 }
 0x892   :  { %v742_v55 = vsel %vm741_vm14, %v1627_v42, %v738_v40  ;;  %v745_v50 = vmul.f32 %v1629_v52, %v744_v54 }
 0x893   :  { %v753_v11 = vmul.f32 %v742_v55, %v719_v7 }
 0x894   :  { %v746_v59 = vmul.f32 0.5, %v745_v50 }
 0x895   :  { %v755_v58 = vmul.f32 %v753_v11, %v2088_v0 }
 0x896   :  { %v747_v60 = vsub.f32 1.5, %v746_v59 }
 0x897   :  { %v2147_v62 = vadd.f32 %v755_v58, %v2091_v8 }
 0x898   :  { %v748_v3 = vmul.f32 %v1629_v52, %v747_v60 }
 0x899   :  { %1523 = vmatmul.msk.f32.vlgmr.msrb.gmra.mxu0 %vm116_vm0, %v2147_v62 }
 0x89a   :  { %v752_v5 = vsel %vm751_vm5, %v1629_v52, %v748_v3 }
 0x89b   :  { %v754_v9 = vmul.f32 %v752_v5, %v720_v33 }
 0x89d   :  { %v756_v12 = vmul.f32 %v754_v9, %v2088_v0  ;;  %v1585_v0 = vld [vmem:[%s2355_s6 + $0x1] ss:$0 sm:$0xff] }
 0x89f   :  { %v2153_v7 = vadd.f32 %v756_v12, %v2091_v8 }
 0x8a1   :  { %1524 = vmatmul.msk.f32.gmra.mxu0 %vm116_vm0, %v2153_v7 }
 0x916   :  { %v914_v8 = vpop.f32.mrf.mxu0 }
 0x917   :  { %v915_v33 = vadd.f32 %v1585_v0, %v914_v8 }
 0x919   :  { %930 = vrot.lane.b32.xlu1 %v915_v33, %s1733_s0  ;;  %v920_v2 = vmul.f32 %v915_v33, %v1879_v36  ;;  %v922_v21 = vmul.f32 %v915_v33, %v1896_v41  ;;  %v924_v23 = vmul.f32 %v915_v33, %v1912_v45 }
 0x91e   :  { %v917_v16 = vpop.f32.mrf.mxu0 }
 0x91f   :  { %v918_v18 = vadd.f32 %v1585_v0, %v917_v16 }
 0x921   :  { %932 = vrot.lane.b32.xlu0 %v918_v18, %s1733_s0  ;;  %v1578_v17 = vpack.i.bf16 %v915_v33, %v918_v18  ;;  %v921_v20 = vmul.f32 %v918_v18, %v1888_v39  ;;  %v923_v22 = vmul.f32 %v918_v18, %v1904_v43  ;;  %v925_v36 = vmul.f32 %v918_v18, %v1920_v47 }
 0x922   :  { %v926_v39 = vmul.f32 %v915_v33, %v1928_v49  ;;  %v927_v41 = vmul.f32 %v918_v18, %v1936_v51 }
 0x98b   :  { %v931_v63 = vpop.permute.xlu1 %930 }
 0x993   :  { %v933_v25 = vpop.permute.xlu0 %932 }
 0x994   :  { %1525 = vmatpush.xpose.msk.msrb.mxu1 %vm116_vm0, %v933_v25 }
 0x998   :  { %1526 = vmatpush.xpose.msk.msrb.mxu1 %vm116_vm0, %v931_v63 }
 0x99b   :  { %1527 = vmatmul.msk.f32.vlgmr.msrb.gmra.mxu1 %vm116_vm0, %v920_v2 }
 0x9a3   :  { %1528 = vmatmul.msk.f32.gmra.mxu1 %vm116_vm0, %v921_v20 }
 0x9ab   :  { %1529 = vmatmul.msk.f32.gmra.mxu1 %vm116_vm0, %v922_v21 }
 0x9b3   :  { %1530 = vmatmul.msk.f32.gmra.mxu1 %vm116_vm0, %v923_v22 }
 0x9bb   :  { %1531 = vmatmul.msk.f32.gmra.mxu1 %vm116_vm0, %v924_v23 }
 0x9c3   :  { %1532 = vmatmul.msk.f32.gmra.mxu1 %vm116_vm0, %v925_v36 }
 0x9cb   :  { %1533 = vmatmul.msk.f32.gmra.mxu1 %vm116_vm0, %v926_v39 }
 0x9d3   :  { %1534 = vmatmul.msk.f32.gmra.mxu1 %vm116_vm0, %v927_v41 }
 0xa18   :  { %v979_v26 = vpop.f32.mrf.mxu1 }
 0xa19   :  { %v980_v43 = vadd.f32 %v979_v26, %v1944_v53 }
 0xa1b   :  { %v1003_v27 = vsel %vm337_vm2, %v980_v43, -inf }
 0xa1c   :  { %1004 = vmax.xlane.f32.xlu2 %v1003_v27 }
 0xa20   :  { %v982_v45 = vpop.f32.mrf.mxu1 }
 0xa21   :  { %v983_v13 = vadd.f32 %v982_v45, %v1951_v57 }
 0xa23   :  { %v1006_v47 = vsel %vm337_vm2, %v983_v13, -inf }
 0xa24   :  { %1007 = vmax.xlane.f32.xlu2 %v1006_v47 }
 0xa28   :  { %v985_v28 = vpop.f32.mrf.mxu1 }
 0xa29   :  { %v986_v49 = vadd.f32 %v985_v28, %v1958_v61 }
 0xa2b   :  { %v1009_v29 = vsel %vm337_vm2, %v986_v49, -inf }
 0xa2c   :  { %1010 = vmax.xlane.f32.xlu0 %v1009_v29 }
 0xa30   :  { %v988_v51 = vpop.f32.mrf.mxu1 }
 0xa31   :  { %v989_v31 = vadd.f32 %v988_v51, %v1965_v1 }
 0xa33   :  { %v1012_v53 = vsel %vm337_vm2, %v989_v31, -inf }
 0xa34   :  { %1013 = vmax.xlane.f32.xlu2 %v1012_v53 }
 0xa38   :  { %v991_v35 = vpop.f32.mrf.mxu1 }
 0xa39   :  { %v992_v37 = vadd.f32 %v991_v35, %v1972_v6 }
 0xa3b   :  { %v1015_v57 = vsel %vm337_vm2, %v992_v37, -inf }
 0xa3c   :  { %1016 = vmax.xlane.f32.xlu1 %v1015_v57 }
 0xa40   :  { %v994_v38 = vpop.f32.mrf.mxu1  ;;  %1579 = vrot.lane.b32.xlu0 %v1578_v17, %s1734_s2  ;;  %s1736_s2 = smov [#allocation5]  }
 0xa41   :  { %v995_v61 = vadd.f32 %v994_v38, %v1979_v10  ;;  %s1462_s25 = sshll.u32 %s1736_s2, 4  ;;  %s1463_s25 = int_to_ptr.vmem [resolvable:$true] %s1462_s25 }
 0xa43   :  { %v1018_v42 = vsel %vm337_vm2, %v995_v61, -inf }
 0xa44   :  { %1019 = vmax.xlane.f32.xlu2 %v1018_v42 }
 0xa48   :  { %v997_v44 = vpop.f32.mrf.mxu1 }
 0xa49   :  { %v998_v1 = vadd.f32 %v997_v44, %v1989_v15 }
 0xa4b   :  { %v1021_v46 = vsel %vm337_vm2, %v998_v1, -inf }
 0xa4c   :  { %1022 = vmax.xlane.f32.xlu2 %v1021_v46 }
 0xa50   :  { %v1000_v4 = vpop.f32.mrf.mxu1 }
 0xa51   :  { %v1001_v6 = vadd.f32 %v1000_v4, %v1996_v19 }
 0xa53   :  { %v1024_v30 = vsel %vm337_vm2, %v1001_v6, -inf }
 0xa54   :  { %1025 = vmax.xlane.f32.xlu2 %v1024_v30 }
 0xa8f   :  { %v1005_v48 = vpop.xlane.xlu2 %1004 }
 0xa90   :  { %v1027_v52 = vsub.f32 %v980_v43, %v1005_v48 }
 0xa92   :  { %v1035_v40 = vmul.f32 1.442695, %v1027_v52 }
 0xa94   :  { %1630 = vpow2.f32 %v1035_v40 }
 0xa97   :  { %v1008_v10 = vpop.xlane.xlu2 %1007 }
 0xa98   :  { %v1028_v54 = vsub.f32 %v983_v13, %v1008_v10 }
 0xa9a   :  { %v1631_v55 = vpop.eup %1630  ;;  %v1037_v50 = vmul.f32 1.442695, %v1028_v54 }
 0xa9b   :  { %v1051_v11 = vsel %vm337_vm2, %v1631_v55, 0.0 }
 0xa9c   :  { %1632 = vpow2.f32 %v1037_v50  ;;  %1052 = vadd.xlane.f32.xlu2 %v1051_v11 }
 0xa9f   :  { %v1011_v15 = vpop.xlane.xlu0 %1010 }
 0xaa0   :  { %v1029_v59 = vsub.f32 %v986_v49, %v1011_v15 }
 0xaa2   :  { %v1633_v58 = vpop.eup %1632  ;;  %v1039_v60 = vmul.f32 1.442695, %v1029_v59  ;;  %v770_v59 = vld [vmem:[#allocation2 + $0xb8] sm:$0xff] }
 0xaa3   :  { %v1054_v19 = vsel %vm337_vm2, %v1633_v58, 0.0  ;;  %1195 = vmatpush.msra.mxu3 %v770_v59 }
 0xaa4   :  { %1634 = vpow2.f32 %v1039_v60  ;;  %1055 = vadd.xlane.f32.xlu2 %v1054_v19  ;;  %v769_v60 = vld [vmem:[#allocation2 + $0xb0] sm:$0xff]  ;;  %v768_v19 = vld [vmem:[#allocation2 + $0xa8] sm:$0xff] }
 0xaa5   :  { %1196 = vmatpush.msra.mxu3 %v769_v60  ;;  %v1549_v60 = vld [vmem:[%s2358_s9 + $0x30] sm:$0xff] }
 0xaa7   :  { %v1014_v3 = vpop.xlane.xlu2 %1013  ;;  %1197 = vmatpush.msra.mxu3 %v768_v19  ;;  %v1548_v19 = vld [vmem:[%s2358_s9 + $0x28] sm:$0xff] }
 0xaa8   :  { %v1030_v5 = vsub.f32 %v989_v31, %v1014_v3  ;;  %v767_v3 = vld [vmem:[#allocation2 + $0xa0] sm:$0xff] }
 0xaa9   :  { %1198 = vmatpush.msra.mxu3 %v767_v3  ;;  %v1547_v3 = vld [vmem:[%s2358_s9 + $0x20] sm:$0xff] }
 0xaaa   :  { %v1635_v9 = vpop.eup %1634  ;;  %v1041_v12 = vmul.f32 1.442695, %v1030_v5 }
 0xaab   :  { %v1057_v14 = vsel %vm337_vm2, %v1635_v9, 0.0 }
 0xaac   :  { %1636 = vpow2.f32 %v1041_v12  ;;  %1058 = vadd.xlane.f32.xlu1 %v1057_v14  ;;  %v789_v12 = vld [vmem:[#allocation2 + $0x130] sm:$0xff] }
 0xaaf   :  { %v1017_v32 = vpop.xlane.xlu1 %1016 }
 0xab0   :  { %v1031_v34 = vsub.f32 %v992_v37, %v1017_v32 }
 0xab2   :  { %v1637_v0 = vpop.eup %1636  ;;  %v1043_v8 = vmul.f32 1.442695, %v1031_v34  ;;  %v1580_v33 = vpop.permute.xlu0 %1579  ;;  %v1670_v34 = vld [vmem:[%s2352_s3 + $0x10] sm:$0xff] }
 0xab3   :  { %v1060_v16 = vsel %vm337_vm2, %v1637_v0, 0.0  ;;  %v1581_v18 = vunpack.i.l.bf16 %v1580_v33  ;;  %v1582_v17 = vunpack.i.h.bf16 %v1580_v33 }
 0xab4   :  { %1638 = vpow2.f32 %v1043_v8  ;;  %1061 = vadd.xlane.f32.xlu2 %v1060_v16  ;;  %v1671_v8 = vld [vmem:[%s2352_s3] sm:$0xff] }
 0xab5   :  { %1135 = vmatpush.msrb.mxu2 %v1581_v18  ;;  %v1672_v16 = vld [vmem:[%s2352_s3 + $0x20] sm:$0xff] }
 0xab7   :  { %1136 = vmatpush.msrb.mxu2 %v1582_v17  ;;  %v1020_v25 = vpop.xlane.xlu2 %1019 }
 0xab8   :  { %v1032_v63 = vsub.f32 %v995_v61, %v1020_v25 }
 0xaba   :  { %v1639_v2 = vpop.eup %1638  ;;  %v1045_v20 = vmul.f32 1.442695, %v1032_v63 }
 0xabb   :  { %v1063_v21 = vsel %vm337_vm2, %v1639_v2, 0.0 }
 0xabc   :  { %1640 = vpow2.f32 %v1045_v20  ;;  %1064 = vadd.xlane.f32.xlu1 %v1063_v21  ;;  %v1674_v21 = vld [vmem:[%s2352_s3 + $0x18] sm:$0xff] }
 0xabf   :  { %v1023_v22 = vpop.xlane.xlu2 %1022 }
 0xac0   :  { %v1033_v23 = vsub.f32 %v998_v1, %v1023_v22 }
 0xac2   :  { %v1641_v36 = vpop.eup %1640  ;;  %v1047_v39 = vmul.f32 1.442695, %v1033_v23 }
 0xac3   :  { %v1066_v41 = vsel %vm337_vm2, %v1641_v36, 0.0 }
 0xac4   :  { %1642 = vpow2.f32 %v1047_v39  ;;  %1067 = vadd.xlane.f32.xlu2 %v1066_v41  ;;  %v1676_v41 = vld [vmem:[%s2352_s3 + $0x28] sm:$0xff] }
 0xac7   :  { %v1026_v26 = vpop.xlane.xlu2 %1025 }
 0xac8   :  { %v1034_v43 = vsub.f32 %v1001_v6, %v1026_v26 }
 0xaca   :  { %v1643_v27 = vpop.eup %1642  ;;  %v1049_v45 = vmul.f32 1.442695, %v1034_v43 }
 0xacb   :  { %v1069_v13 = vsel %vm337_vm2, %v1643_v27, 0.0 }
 0xacc   :  { %1644 = vpow2.f32 %v1049_v45  ;;  %1070 = vadd.xlane.f32.xlu0 %v1069_v13  ;;  %v1677_v13 = vld [vmem:[%s2352_s3 + $0x38] sm:$0xff] }
 0xad2   :  { %v1645_v47 = vpop.eup %1644 }
 0xad3   :  { %v1072_v28 = vsel %vm337_vm2, %v1645_v47, 0.0 }
 0xad4   :  { %1073 = vadd.xlane.f32.xlu1 %v1072_v28 }
 0xb0f   :  { %v1053_v49 = vpop.xlane.xlu2 %1052 }
 0xb10   :  { %1646 = vrcp.f32 %v1053_v49  ;;  %v788_v49 = vld [vmem:[#allocation2 + $0x128] sm:$0xff] }
 0xb16   :  { %v1647_v29 = vpop.eup %1646 }
 0xb17   :  { %v1056_v51 = vpop.xlane.xlu2 %1055  ;;  %v1083_v31 = vmul.f32 %v1647_v29, %v1631_v55  ;;  %v787_v29 = vld [vmem:[#allocation2 + $0x120] sm:$0xff] }
 0xb18   :  { %1648 = vrcp.f32 %v1056_v51  ;;  %v882_v51 = vpop.f32.mrf.mxu3 }
 0xb19   :  { %1535 = vmatmul.msk.f32.vlgmr.msrb.gmra.mxu2 %vm337_vm2, %v1083_v31 }
 0xb1e   :  { %v1649_v53 = vpop.eup %1648 }
 0xb1f   :  { %v1059_v35 = vpop.xlane.xlu1 %1058  ;;  %v1084_v37 = vmul.f32 %v1649_v53, %v1633_v58  ;;  %v1176_v53 = vperm.slane %v2121_v56, 0 }
 0xb20   :  { %1650 = vrcp.f32 %v1059_v35  ;;  %v885_v31 = vpop.f32.mrf.mxu3 }
 0xb21   :  { %1536 = vmatmul.msk.f32.gmra.mxu2 %vm337_vm2, %v1084_v37 }
 0xb26   :  { %v1651_v57 = vpop.eup %1650 }
 0xb27   :  { %v1062_v38 = vpop.xlane.xlu2 %1061  ;;  %v1085_v61 = vmul.f32 %v1651_v57, %v1635_v9  ;;  %v790_v9 = vld [vmem:[#allocation2 + $0x138] sm:$0xff] }
 0xb28   :  { %1652 = vrcp.f32 %v1062_v38  ;;  %1224 = vmatpush.msra.mxu0 %v790_v9 }
 0xb29   :  { %1537 = vmatmul.msk.f32.gmra.mxu2 %vm337_vm2, %v1085_v61 }
 0xb2a   :  { %1225 = vmatpush.msra.mxu0 %v789_v12 }
 0xb2c   :  { %1226 = vmatpush.msra.mxu0 %v788_v49 }
 0xb2e   :  { %v1653_v42 = vpop.eup %1652  ;;  %1227 = vmatpush.msra.mxu0 %v787_v29 }
 0xb2f   :  { %v1065_v44 = vpop.xlane.xlu1 %1064  ;;  %v1086_v1 = vmul.f32 %v1653_v42, %v1637_v0 }
 0xb30   :  { %1654 = vrcp.f32 %v1065_v44 }
 0xb31   :  { %1538 = vmatmul.msk.f32.gmra.mxu2 %vm337_vm2, %v1086_v1 }
 0xb36   :  { %v1655_v46 = vpop.eup %1654 }
 0xb37   :  { %v1068_v4 = vpop.xlane.xlu2 %1067  ;;  %v1087_v6 = vmul.f32 %v1655_v46, %v1639_v2  ;;  %v1673_v2 = vld [vmem:[%s2352_s3 + $0x30] sm:$0xff] }
 0xb38   :  { %1656 = vrcp.f32 %v1068_v4 }
 0xb39   :  { %1539 = vmatmul.msk.f32.gmra.mxu2 %vm337_vm2, %v1087_v6 }
 0xb3e   :  { %v1657_v30 = vpop.eup %1656 }
 0xb3f   :  { %v1071_v48 = vpop.xlane.xlu0 %1070  ;;  %v1088_v52 = vmul.f32 %v1657_v30, %v1641_v36  ;;  %v1675_v36 = vld [vmem:[%s2352_s3 + $0x8] sm:$0xff] }
 0xb40   :  { %1658 = vrcp.f32 %v1071_v48 }
 0xb41   :  { %1540 = vmatmul.msk.f32.gmra.mxu2 %vm337_vm2, %v1088_v52 }
 0xb46   :  { %v1659_v40 = vpop.eup %1658 }
 0xb47   :  { %v1074_v10 = vpop.xlane.xlu1 %1073  ;;  %v1089_v54 = vmul.f32 %v1659_v40, %v1643_v27 }
 0xb48   :  { %1660 = vrcp.f32 %v1074_v10 }
 0xb49   :  { %1541 = vmatmul.msk.f32.gmra.mxu2 %vm337_vm2, %v1089_v54 }
 0xb4e   :  { %v1661_v55 = vpop.eup %1660 }
 0xb4f   :  { %v1090_v50 = vmul.f32 %v1661_v55, %v1645_v47 }
 0xb51   :  { %1542 = vmatmul.msk.f32.gmra.mxu2 %vm337_vm2, %v1090_v50 }
 0xb9c   :  { %v1138_v11 = vpop.f32.mrf.mxu2 }
 0xb9d   :  { %v1162_v33 = vmul.f32 %v1671_v8, %v1138_v11 }
 0xba4   :  { %v1141_v15 = vpop.f32.mrf.mxu2 }
 0xba5   :  { %v1163_v39 = vmul.f32 %v1675_v36, %v1141_v15  ;;  %v2286_v36 = vperm.slane %v2121_v56, 4 }
 0xbac   :  { %v1144_v58 = vpop.f32.mrf.mxu2 }
 0xbad   :  { %v1164_v0 = vmul.f32 %v1670_v34, %v1144_v58  ;;  %v1559_v34 = vld [vmem:[%s2360_s11 + $0x68] sm:$0xff] }
 0xbaf   :  { %v1170_v17 = vadd.f32 %v1164_v0, %v1162_v33  ;;  %v1558_v33 = vld [vmem:[%s2360_s11 + $0x60] sm:$0xff] }
 0xbb4   :  { %v1147_v5 = vpop.f32.mrf.mxu2 }
 0xbb5   :  { %v1165_v22 = vmul.f32 %v1674_v21, %v1147_v5 }
 0xbb7   :  { %v1171_v43 = vadd.f32 %v1165_v22, %v1163_v39 }
 0xbbc   :  { %v1150_v14 = vpop.f32.mrf.mxu2 }
 0xbbd   :  { %v1166_v18 = vmul.f32 %v1672_v16, %v1150_v14  ;;  %v1561_v14 = vld [vmem:[%s2360_s11 + $0x78] sm:$0xff] }
 0xbbe   :  { %1354 = vmatpush.msrb.mxu0 %v1561_v14 }
 0xbbf   :  { %v1172_v63 = vadd.f32 %v1170_v17, %v1166_v18  ;;  %v1557_v17 = vld [vmem:[%s2360_s11 + $0x58] sm:$0xff] }
 0xbc4   :  { %v1153_v32 = vpop.f32.mrf.mxu2 }
 0xbc5   :  { %v1167_v26 = vmul.f32 %v1676_v41, %v1153_v32  ;;  %v1560_v32 = vld [vmem:[%s2360_s11 + $0x70] sm:$0xff] }
 0xbc6   :  { %1355 = vmatpush.msrb.mxu0 %v1560_v32 }
 0xbc7   :  { %v1173_v45 = vadd.f32 %v1171_v43, %v1167_v26  ;;  %v2289_v43 = vperm.slane %v2121_v56, 5 }
 0xbc8   :  { %1356 = vmatpush.msrb.mxu0 %v1559_v34 }
 0xbca   :  { %1357 = vmatpush.msrb.mxu0 %v1558_v33 }
 0xbcc   :  { %v1156_v25 = vpop.f32.mrf.mxu2  ;;  %1358 = vmatpush.msrb.mxu0 %v1557_v17 }
 0xbcd   :  { %v1168_v20 = vmul.f32 %v1673_v2, %v1156_v25 }
 0xbcf   :  { %v1174_v23 = vadd.f32 %v1172_v63, %v1168_v20 }
 0xbd1   :  { %1543 = vmatmul.msk.f32.vlgmr.msra.gmra.mxu3 %vm116_vm0, %v1174_v23 }
 0xbd4   :  { %v1159_v27 = vpop.f32.mrf.mxu2 }
 0xbd5   :  { %v1169_v47 = vmul.f32 %v1677_v13, %v1159_v27 }
 0xbd7   :  { %v1175_v28 = vadd.f32 %v1173_v45, %v1169_v47 }
 0xbd9   :  { %1544 = vmatmul.msk.f32.gmra.mxu3 %vm116_vm0, %v1175_v28 }
 0xc54   :  { %v1200_v35 = vpop.f32.mrf.mxu3 }
 0xc55   :  { %v1201_v37 = vadd.f32 %v1200_v35, %v1176_v53  ;;  %v1555_v35 = vld [vmem:[%s2360_s11 + $0x48] sm:$0xff] }
 0xc57   :  { %1545 = vmatmul.msk.f32.vlgmr.msra.gmra.mxu0 %vm116_vm0, %v1201_v37  ;;  %v1554_v37 = vld [vmem:[%s2360_s11 + $0x40] sm:$0xff] }
 0xc5c   :  { %v1203_v57 = vpop.f32.mrf.mxu3 }
 0xc5d   :  { %v1204_v38 = vadd.f32 %v1203_v57, %v1176_v53  ;;  %v1556_v53 = vld [vmem:[%s2360_s11 + $0x50] sm:$0xff]  ;;  %v1586_v57 = vld [vmem:[%s2359_s10 + $0x1] ss:$0 sm:$0xff] }
 0xc5e   :  { %1359 = vmatpush.msrb.mxu0 %v1556_v53 }
 0xc5f   :  { %1546 = vmatmul.msk.f32.gmra.mxu0 %vm116_vm0, %v1204_v38 }
 0xc60   :  { %1360 = vmatpush.msrb.mxu0 %v1555_v35 }
 0xc62   :  { %1361 = vmatpush.msrb.mxu0 %v1554_v37 }
 0xcd4   :  { %v1229_v61 = vpop.f32.mrf.mxu0 }
 0xcd5   :  { %v1230_v42 = vadd.f32 %v1229_v61, %v882_v51 }
 0xcd7   :  { %v1235_v44 = vmax.f32 %v1230_v42, 0.0 }
 0xcd9   :  { %v1237_v1 = vadd.f32 %v1235_v44, %v2147_v62 }
 0xcdb   :  { %v1239_v46 = vsel %vm116_vm0, %v1237_v1, 0.0 }
 0xcdc   :  { %1240 = vadd.xlane.f32.xlu2 %v1239_v46  ;;  %v1232_v4 = vpop.f32.mrf.mxu0 }
 0xcdd   :  { %v1233_v6 = vadd.f32 %v1232_v4, %v885_v31  ;;  %v1339_v4 = vperm.slane %v2121_v56, 6 }
 0xcdf   :  { %v1236_v30 = vmax.f32 %v1233_v6, 0.0 }
 0xce1   :  { %v1238_v48 = vadd.f32 %v1236_v30, %v2153_v7  ;;  %v1550_v7 = vld [vmem:[%s2358_s9 + $0x38] sm:$0xff] }
 0xce2   :  { %1317 = vmatpush.msrb.mxu3 %v1550_v7 }
 0xce3   :  { %v1242_v52 = vsel %vm116_vm0, %v1238_v48, 0.0 }
 0xce4   :  { %1243 = vadd.xlane.f32.xlu1 %v1242_v52  ;;  %1318 = vmatpush.msrb.mxu3 %v1549_v60 }
 0xce6   :  { %1319 = vmatpush.msrb.mxu3 %v1548_v19 }
 0xce8   :  { %1320 = vmatpush.msrb.mxu3 %v1547_v3  ;;  %v1422_v3 = vld [vmem:[%s2361_s12 + $0x18] sm:$0xff] }
 0xcea   :  { %1445 = vmatpush.msra.mxu3 %v1422_v3 }
 0xd4f   :  { %v1241_v40 = vpop.xlane.xlu2 %1240 }
 0xd50   :  { %v1245_v10 = vmul.f32 %v1241_v40, %v2052_v24 }
 0xd52   :  { %v1247_v54 = vsub.f32 %v1237_v1, %v1245_v10 }
 0xd54   :  { %v1249_v55 = vmul.f32 %v1247_v54, %v1247_v54 }
 0xd56   :  { %v1251_v50 = vsel %vm116_vm0, %v1249_v55, 0.0 }
 0xd57   :  { %1252 = vadd.xlane.f32.xlu2 %v1251_v50  ;;  %v1244_v62 = vpop.xlane.xlu1 %1243 }
 0xd58   :  { %v1246_v11 = vmul.f32 %v1244_v62, %v2052_v24 }
 0xd5a   :  { %v1248_v15 = vsub.f32 %v1238_v48, %v1246_v11 }
 0xd5c   :  { %v1250_v59 = vmul.f32 %v1248_v15, %v1248_v15 }
 0xd5e   :  { %v1254_v58 = vsel %vm116_vm0, %v1250_v59, 0.0 }
 0xd5f   :  { %1255 = vadd.xlane.f32.xlu1 %v1254_v58 }
 0xdca   :  { %v1253_v5 = vpop.xlane.xlu2 %1252 }
 0xdcb   :  { %v1257_v9 = vmul.f32 %v1253_v5, %v2052_v24  ;;  %v1421_v5 = vld [vmem:[%s2361_s12 + $0x10] sm:$0xff] }
 0xdcc   :  { %1446 = vmatpush.msra.mxu3 %v1421_v5 }
 0xdcd   :  { %v1259_v12 = vadd.f32 1e-05, %v1257_v9  ;;  %v1420_v9 = vld [vmem:[%s2361_s12 + $0x8] sm:$0xff] }
 0xdce   :  { %1447 = vmatpush.msra.mxu3 %v1420_v9 }
 0xdcf   :  { %1662 = vrsqrt.f32 %v1259_v12  ;;  %vm1267_vm3 = vweird.f32 %v1259_v12 }
 0xdd2   :  { %v1256_v0 = vpop.xlane.xlu1 %1255 }
 0xdd3   :  { %v1258_v8 = vmul.f32 %v1256_v0, %v2052_v24 }
 0xdd5   :  { %v1663_v16 = vpop.eup %1662  ;;  %v1260_v18 = vadd.f32 1e-05, %v1258_v8 }
 0xdd6   :  { %v1262_v25 = vmul.f32 %v1663_v16, %v1259_v12  ;;  %vm1268_vm1 = vweird.f32 %v1663_v16  ;;  %v1419_v12 = vld [vmem:[%s2361_s12] sm:$0xff] }
 0xdd7   :  { %1664 = vrsqrt.f32 %v1260_v18  ;;  %vm1269_vm6 = vmor %vm1267_vm3, %vm1268_vm1  ;;  %vm1277_vm8 = vweird.f32 %v1260_v18  ;;  %1448 = vmatpush.msra.mxu3 %v1419_v12 }
 0xdd8   :  { %v1263_v63 = vmul.f32 %v1663_v16, %v1262_v25 }
 0xdda   :  { %v1264_v2 = vmul.f32 0.5, %v1263_v63 }
 0xddc   :  { %v1265_v20 = vsub.f32 1.5, %v1264_v2 }
 0xddd   :  { %v1665_v21 = vpop.eup %1664 }
 0xdde   :  { %v1266_v22 = vmul.f32 %v1663_v16, %v1265_v20  ;;  %v1272_v23 = vmul.f32 %v1665_v21, %v1260_v18  ;;  %vm1278_vm7 = vweird.f32 %v1665_v21 }
 0xddf   :  { %vm1279_vm9 = vmor %vm1277_vm8, %vm1278_vm7 }
 0xde0   :  { %v1270_v39 = vsel %vm1269_vm6, %v1663_v16, %v1266_v22  ;;  %v1273_v41 = vmul.f32 %v1665_v21, %v1272_v23 }
 0xde1   :  { %v1281_v26 = vmul.f32 %v1270_v39, %v1247_v54 }
 0xde2   :  { %v1274_v27 = vmul.f32 0.5, %v1273_v41 }
 0xde3   :  { %v1284_v45 = vmul.f32 %v2286_v36, %v1281_v26 }
 0xde4   :  { %v1275_v13 = vsub.f32 1.5, %v1274_v27 }
 0xde5   :  { %v1287_v47 = vadd.f32 %v2289_v43, %v1284_v45 }
 0xde6   :  { %v1276_v28 = vmul.f32 %v1665_v21, %v1275_v13 }
 0xde7   :  { %1552 = vmatmul.msk.f32.vlgmr.msrb.gmra.mxu3 %vm116_vm0, %v1287_v47 }
 0xde8   :  { %v1280_v49 = vsel %vm1279_vm9, %v1665_v21, %v1276_v28 }
 0xde9   :  { %v1282_v29 = vmul.f32 %v1280_v49, %v1248_v15 }
 0xdeb   :  { %v1285_v51 = vmul.f32 %v2286_v36, %v1282_v29  ;;  %v1587_v29 = vld [vmem:[%s2362_s13] ss:$0 sm:$0xff] }
 0xded   :  { %v1288_v31 = vadd.f32 %v2289_v43, %v1285_v51 }
 0xdef   :  { %1553 = vmatmul.msk.f32.gmra.mxu3 %vm116_vm0, %v1288_v31 }
 0xe6a   :  { %v1322_v38 = vpop.f32.mrf.mxu3 }
 0xe6b   :  { %v1323_v61 = vadd.f32 %v1586_v57, %v1322_v38 }
 0xe6d   :  { %v1328_v42 = vmax.f32 %v1323_v61, 0.0 }
 0xe6f   :  { %1562 = vmatmul.msk.f32.vlgmr.msrb.gmra.mxu0 %vm679_vm11, %v1328_v42 }
 0xe72   :  { %v1325_v44 = vpop.f32.mrf.mxu3 }
 0xe73   :  { %v1326_v1 = vadd.f32 %v1586_v57, %v1325_v44 }
 0xe75   :  { %v1329_v46 = vmax.f32 %v1326_v1, 0.0 }
 0xe77   :  { %1563 = vmatmul.msk.f32.gmra.mxu0 %vm679_vm11, %v1329_v46 }
 0xeec   :  { %v1363_v6 = vpop.f32.mrf.mxu0 }
 0xeed   :  { %v1364_v30 = vadd.f32 %v1363_v6, %v1339_v4 }
 0xeef   :  { %v1369_v48 = vadd.f32 %v1364_v30, %v1287_v47 }
 0xef1   :  { %v1371_v52 = vsel %vm116_vm0, %v1369_v48, 0.0 }
 0xef2   :  { %1372 = vadd.xlane.f32.xlu2 %v1371_v52 }
 0xef4   :  { %v1366_v40 = vpop.f32.mrf.mxu0 }
 0xef5   :  { %v1367_v10 = vadd.f32 %v1366_v40, %v1339_v4 }
 0xef7   :  { %v1370_v54 = vadd.f32 %v1367_v10, %v1288_v31 }
 0xef9   :  { %v1374_v55 = vsel %vm116_vm0, %v1370_v54, 0.0 }
 0xefa   :  { %1375 = vadd.xlane.f32.xlu1 %v1374_v55 }
 0xf65   :  { %v1373_v50 = vpop.xlane.xlu2 %1372 }
 0xf66   :  { %v1377_v62 = vmul.f32 %v1373_v50, %v2052_v24 }
 0xf68   :  { %v1379_v11 = vsub.f32 %v1369_v48, %v1377_v62 }
 0xf6a   :  { %v1381_v15 = vmul.f32 %v1379_v11, %v1379_v11 }
 0xf6c   :  { %v1383_v59 = vsel %vm116_vm0, %v1381_v15, 0.0 }
 0xf6d   :  { %1384 = vadd.xlane.f32.xlu2 %v1383_v59  ;;  %v1376_v56 = vpop.xlane.xlu1 %1375 }
 0xf6e   :  { %v1378_v58 = vmul.f32 %v1376_v56, %v2052_v24 }
 0xf70   :  { %v1380_v7 = vsub.f32 %v1370_v54, %v1378_v58 }
 0xf72   :  { %v1382_v60 = vmul.f32 %v1380_v7, %v1380_v7 }
 0xf74   :  { %v1386_v19 = vsel %vm116_vm0, %v1382_v60, 0.0 }
 0xf75   :  { %1387 = vadd.xlane.f32.xlu1 %v1386_v19 }
 0xfe0   :  { %v1385_v14 = vpop.xlane.xlu2 %1384 }
 0xfe1   :  { %v1389_v32 = vmul.f32 %v1385_v14, %v2052_v24 }
 0xfe3   :  { %v1391_v34 = vadd.f32 1e-05, %v1389_v32 }
 0xfe5   :  { %1666 = vrsqrt.f32 %v1391_v34  ;;  %vm1399_vm11 = vweird.f32 %v1391_v34 }
 0xfe8   :  { %v1388_v0 = vpop.xlane.xlu1 %1387 }
 0xfe9   :  { %v1390_v8 = vmul.f32 %v1388_v0, %v2052_v24 }
 0xfeb   :  { %v1667_v33 = vpop.eup %1666  ;;  %v1392_v16 = vadd.f32 1e-05, %v1390_v8 }
 0xfec   :  { %v1394_v18 = vmul.f32 %v1667_v33, %v1391_v34  ;;  %vm1400_vm10 = vweird.f32 %v1667_v33 }
 0xfed   :  { %1668 = vrsqrt.f32 %v1392_v16  ;;  %vm1401_vm12 = vmor %vm1399_vm11, %vm1400_vm10  ;;  %vm1409_vm14 = vweird.f32 %v1392_v16 }
 0xfee   :  { %v1395_v17 = vmul.f32 %v1667_v33, %v1394_v18 }
 0xff0   :  { %v1396_v25 = vmul.f32 0.5, %v1395_v17 }
 0xff2   :  { %v1397_v63 = vsub.f32 1.5, %v1396_v25 }
 0xff3   :  { %v1669_v2 = vpop.eup %1668 }
 0xff4   :  { %v1398_v20 = vmul.f32 %v1667_v33, %v1397_v63  ;;  %v1404_v21 = vmul.f32 %v1669_v2, %v1392_v16  ;;  %vm1410_vm13 = vweird.f32 %v1669_v2 }
 0xff5   :  { %vm1411_vm15 = vmor %vm1409_vm14, %vm1410_vm13 }
 0xff6   :  { %v1402_v22 = vsel %vm1401_vm12, %v1667_v33, %v1398_v20  ;;  %v1405_v23 = vmul.f32 %v1669_v2, %v1404_v21 }
 0xff7   :  { %v1413_v39 = vmul.f32 %v1402_v22, %v1379_v11 }
 0xff8   :  { %v1406_v41 = vmul.f32 0.5, %v1405_v23 }
 0xff9   :  { %v1415_v26 = vmul.f32 %v1413_v39, %v2286_v36 }
 0xffa   :  { %v1407_v24 = vsub.f32 1.5, %v1406_v41 }
 0xffb   :  { %v1417_v27 = vadd.f32 %v1415_v26, %v2289_v43 }
 0xffc   :  { %v1408_v45 = vmul.f32 %v1669_v2, %v1407_v24 }
 0xffd   :  { %1564 = vmatmul.msk.f32.vlgmr.msra.gmra.mxu3 %vm116_vm0, %v1417_v27 }
 0xffe   :  { %v1412_v13 = vsel %vm1411_vm15, %v1669_v2, %v1408_v45 }
 0xfff   :  { %v1414_v47 = vmul.f32 %v1412_v13, %v1380_v7 }
0x1001   :  { %v1416_v28 = vmul.f32 %v1414_v47, %v2286_v36 }
0x1003   :  { %v1418_v49 = vadd.f32 %v1416_v28, %v2289_v43 }
0x1005   :  { %1565 = vmatmul.msk.f32.gmra.mxu3 %vm116_vm0, %v1418_v49 }
0x1080   :  { %v1450_v51 = vpop.f32.mrf.mxu3 }
0x1081   :  { %v1451_v31 = vadd.f32 %v1587_v29, %v1450_v51 }
0x1083   :  { %1456 = vst.msk [vmem:[#allocation5] sm:$0xff] %vm337_vm2, %v1451_v31 }
0x1088   :  { %v1453_v53 = vpop.f32.mrf.mxu3 }
0x1089   :  { %v1454_v36 = vadd.f32 %v1587_v29, %v1453_v53 }
0x108b   :  { %1457 = vst.msk [vmem:[#allocation5 + $0x8] sm:$0xff] %vm337_vm2, %v1454_v36 }
0x108c   :  { %1470 = dma.vmem_to_hbm [thread:$0]  %s1463_s25, 256, %s1465_s28, [#allocation4], %s1731_s18, %s1731_s18, %s1732_s19  }
0x108d   :  { %1728 = dma.done.wait [#allocation4], 256  }
0x108e   :  { %1729 = vsyncadd [#allocation4], 4294967040 }
0x108f   :  { %1475 = vsyncpa [#allocation3], 1 }
0x1090   :  { %1476 = vsyncpa [#allocation4], 1 }

</bundles_post_ra>
